<compile_context>
chip_gen: v5e
topology: v5e:2x2
jax: 0.10.0
libtpu: 0.0.40
codegen_flags: <defaults>
</compile_context>

<pallas_src>
import jax
import jax.numpy as jnp
from jax.experimental import pallas as pl
from jax.experimental.pallas import tpu as pltpu


# ----------------------------------------------------------------------------
# helpers
# ----------------------------------------------------------------------------
def _pick_chunk(n, max_chunk=8):
    """Largest divisor of n that is <= max_chunk (time-chunk size)."""
    for c in range(min(max_chunk, n), 0, -1):
        if n % c == 0:
            return c
    return 1


def _vmem_limit_bytes():
    """Generation-aware scoped-VMEM budget.

    v5e/v6e have 128 MiB physical VMEM -> 96 MiB budget; v7x has 64 MiB
    physical -> 48 MiB (leaves double-buffer headroom); unknown -> 48 MiB.
    """
    try:
        kind = jax.devices()[0].device_kind.lower()
    except Exception:
        kind = ""
    if "v5" in kind or "v6" in kind:
        return 96 * 1024 * 1024
    return 48 * 1024 * 1024


# ----------------------------------------------------------------------------
# Encoder kernel: one grid step per CHUNK of source positions.
#   x_ref   : (CH, B, E) bf16  embedded source tokens for this chunk (streamed)
#   wih/whh : (E,4H)/(H,4H) bf16 gate weights                        (resident)
#   b_ref   : (1, 4H)    f32   bias                                   (resident)
#   enc_ref : (CH, B, H) bf16  hidden states for this chunk          (streamed)
#   h_ref   : (B, H)     f32   final hidden (written on last chunk only)
#   c_ref   : (B, H)     f32   final cell   (written on last chunk only)
#   h_s,c_s : (B, H)     f32   recurrent state (VMEM scratch, persists)
# ----------------------------------------------------------------------------
def encoder_kernel(x_ref, wih_ref, whh_ref, b_ref,
                   enc_ref, h_ref, c_ref, h_s, c_s):
    chunk = pl.program_id(0)
    n_chunks = pl.num_programs(0)
    CH = x_ref.shape[0]
    H = h_s.shape[1]

    @pl.when(chunk == 0)
    def _():
        h_s[...] = jnp.zeros_like(h_s)
        c_s[...] = jnp.zeros_like(c_s)

    # hoist step-invariant loads out of the unrolled loop
    wih = wih_ref[...]                                        # (E, 4H) bf16
    whh = whh_ref[...]                                        # (H, 4H) bf16
    b = b_ref[...]                                            # (1, 4H) f32

    def step(i, carry):
        h, c = carry                                          # (B, H) f32
        x_t = x_ref[i]                                        # (B, E) bf16
        # split dots (no lane-axis concat), bf16 MXU, f32 accumulate
        gates = (jnp.dot(x_t, wih, preferred_element_type=jnp.float32)
                 + jnp.dot(h.astype(jnp.bfloat16), whh,
                           preferred_element_type=jnp.float32)
                 + b)                                         # (B, 4H) f32
        # NOTE: for production sizes make H a multiple of 128 so these gate
        # slices are lane-aligned.
        i_g = jax.nn.sigmoid(gates[:, 0:H])
        f_g = jax.nn.sigmoid(gates[:, H:2 * H])
        g_g = jnp.tanh(gates[:, 2 * H:3 * H])
        o_g = jax.nn.sigmoid(gates[:, 3 * H:4 * H])
        c_new = f_g * c + i_g * g_g
        h_new = o_g * jnp.tanh(c_new)
        enc_ref[i] = h_new.astype(enc_ref.dtype)              # streamed to HBM
        return h_new, c_new

    h_fin, c_fin = jax.lax.fori_loop(0, CH, step, (h_s[...], c_s[...]),
                                     unroll=True)
    h_s[...] = h_fin
    c_s[...] = c_fin

    # final state written to the HBM-resident blocks only once (last chunk)
    @pl.when(chunk == n_chunks - 1)
    def _():
        h_ref[...] = h_fin
        c_ref[...] = c_fin


# ----------------------------------------------------------------------------
# Decoder kernel: one grid step per CHUNK of target positions.
#   use_tf_ref : (T,) int32 SMEM (scalar prefetch)  1 -> teacher forcing
#   trg_emb_ref: (CH, B, E) bf16   embedded target tokens (streamed)
#   emb_tbl_ref: (Vp, E)    bf16   decoder embedding table (resident)
#   enc_ref    : (B, S, H)  bf16   encoder outputs, batch-major (resident)
#   len_ref    : (B, 1)     int32  source lengths (attention mask)
#   out_ref    : (CH, B, Vp) f32   logits for this chunk (streamed out)
#   scratch    : h_s/c_s (B,H) f32, x_s (B,E) bf16
# ----------------------------------------------------------------------------
def decoder_kernel(use_tf_ref, trg_emb_ref, emb_tbl_ref, enc_ref, len_ref,
                   h0_ref, c0_ref, w_e_ref, w_c_ref, w_h_ref, b_ref,
                   wout_h_ref, wout_c_ref, bout_ref,
                   out_ref, h_s, c_s, x_s):
    chunk = pl.program_id(0)
    CH = out_ref.shape[0]
    B, S, H = enc_ref.shape
    Vp = out_ref.shape[2]
    bf16 = jnp.bfloat16

    @pl.when(chunk == 0)
    def _():
        h_s[...] = h0_ref[...]
        c_s[...] = c0_ref[...]
        x_s[...] = trg_emb_ref[0]                             # input = trg[:,0]

    # hoist step-invariant loads / precompute attention mask
    enc = enc_ref[...]                                        # (B, S, H) bf16
    emb_tbl = emb_tbl_ref[...]                                # (Vp, E) bf16
    w_e = w_e_ref[...]
    w_c = w_c_ref[...]
    w_h = w_h_ref[...]
    b = b_ref[...]
    wout_h = wout_h_ref[...]
    wout_c = wout_c_ref[...]
    bout = bout_ref[...]
    pos = jax.lax.broadcasted_iota(jnp.int32, (B, 1, S), 2)
    neg_mask = jnp.where(pos < len_ref[...][:, :, None], 0.0, -1e30)  # (B,1,S)

    def step(i, carry):
        h, c = carry                                          # (B, H) f32
        t = chunk * CH + i                                    # global step
        x_emb = x_s[...]                                      # (B, E) bf16

        # --- attention: batched bf16 MXU contractions (q == 1) ---
        hq = h.astype(bf16)[:, None, :]                       # (B, 1, H)
        scores = jnp.einsum("bqh,bsh->bqs", hq, enc,
                            preferred_element_type=jnp.float32) + neg_mask
        scores = scores - jnp.max(scores, axis=-1, keepdims=True)
        e_s = jnp.exp(scores)
        attn = e_s * pl.reciprocal(jnp.sum(e_s, axis=-1, keepdims=True),
                                   approx=True)               # (B, 1, S)
        ctx = jnp.einsum("bqs,bsh->bqh", attn.astype(bf16), enc,
                         preferred_element_type=jnp.float32)[:, 0, :]  # (B,H)
        ctx_b = ctx.astype(bf16)

        # --- LSTM gates: split dots on emb / ctx / h (no concat) ---
        gates = (jnp.dot(x_emb, w_e, preferred_element_type=jnp.float32)
                 + jnp.dot(ctx_b, w_c, preferred_element_type=jnp.float32)
                 + jnp.dot(h.astype(bf16), w_h,
                           preferred_element_type=jnp.float32)
                 + b)                                         # (B, 4H) f32
        i_g = jax.nn.sigmoid(gates[:, 0:H])
        f_g = jax.nn.sigmoid(gates[:, H:2 * H])
        g_g = jnp.tanh(gates[:, 2 * H:3 * H])
        o_g = jax.nn.sigmoid(gates[:, 3 * H:4 * H])
        c_new = f_g * c + i_g * g_g
        h_new = o_g * jnp.tanh(c_new)

        # --- output projection: split dots on h / ctx (lane-dense Vp) ---
        logits = (jnp.dot(h_new.astype(bf16), wout_h,
                          preferred_element_type=jnp.float32)
                  + jnp.dot(ctx_b, wout_c,
                            preferred_element_type=jnp.float32)
                  + bout)                                     # (B, Vp) f32

        valid = t > 0                                         # t==0 -> zeros
        out_ref[i] = jnp.where(valid, logits, 0.0)

        # --- next input: teacher forcing vs greedy argmax ---
        teacher_emb = trg_emb_ref[i]                          # (B, E) bf16

        def greedy():
            iota_v = jax.lax.broadcasted_iota(jnp.int32, (B, Vp), 1)
            m = jnp.max(logits, axis=1, keepdims=True)
            top1 = jnp.min(jnp.where(logits == m, iota_v, Vp), axis=1,
                           keepdims=True)                     # (B, 1)
            onehot = (iota_v == top1).astype(bf16)            # (B, Vp)
            # TODO(synk): for large vocabularies replace this one-hot matmul
            # with a DMA row-gather from an HBM-resident embedding table.
            ge = jnp.dot(onehot, emb_tbl,
                         preferred_element_type=jnp.float32)  # (B, E)
            return ge.astype(bf16)

        # t==0 always takes trg[:,0]; otherwise lax.cond skips the argmax /
        # one-hot work on teacher-forced steps.
        eff_tf = jnp.logical_or(t == 0, use_tf_ref[t] == 1)
        next_emb = jax.lax.cond(eff_tf, lambda: teacher_emb, greedy)
        x_s[...] = next_emb

        h_out = jnp.where(valid, h_new, h)
        c_out = jnp.where(valid, c_new, c)
        return h_out, c_out

    h_fin, c_fin = jax.lax.fori_loop(0, CH, step, (h_s[...], c_s[...]),
                                     unroll=True)
    h_s[...] = h_fin
    c_s[...] = c_fin


# ----------------------------------------------------------------------------
# Wrapper: embedding lookups, weight casts/padding, pallas_call plumbing.
# ----------------------------------------------------------------------------
def seq2seq_forward(params, src, src_len, trg, teacher_forcing_ratio=0.5,
                    key=None):
    B, S = src.shape
    T = trg.shape[1]
    E = params["enc_emb"].shape[1]
    H = params["enc_whh"].shape[0]
    V = params["dec_bout"].shape[1]
    f32, bf16 = jnp.float32, jnp.bfloat16

    Vp = max(128, ((V + 127) // 128) * 128)                   # lane-dense vocab
    pad_v = Vp - V

    # embedding lookups (glue, plain JAX), time-major, bf16 for the MXU
    src_emb_tm = jnp.transpose(jnp.take(params["enc_emb"], src, axis=0),
                               (1, 0, 2)).astype(bf16)        # (S, B, E)
    trg_emb_tm = jnp.transpose(jnp.take(params["dec_emb"], trg, axis=0),
                               (1, 0, 2)).astype(bf16)        # (T, B, E)

    # bf16 weights (biases stay f32); kept un-fused so the kernels use
    # concat-free split dots.
    enc_wih = params["enc_wih"].astype(bf16)                  # (E, 4H)
    enc_whh = params["enc_whh"].astype(bf16)                  # (H, 4H)
    enc_b = params["enc_b"].astype(f32)                       # (1, 4H)
    dec_w_e = params["dec_wih_e"].astype(bf16)                # (E, 4H)
    dec_w_c = params["dec_wih_c"].astype(bf16)                # (H, 4H)
    dec_w_h = params["dec_whh"].astype(bf16)                  # (H, 4H)
    dec_b = params["dec_b"].astype(f32)                       # (1, 4H)

    # vocab-padded output projection / embedding table (padded bias = -1e30 so
    # greedy argmax never selects a padded column; padded emb rows are zero).
    wout_h = jnp.pad(params["dec_wout_h"], ((0, 0), (0, pad_v))).astype(bf16)
    wout_c = jnp.pad(params["dec_wout_c"], ((0, 0), (0, pad_v))).astype(bf16)
    bout = jnp.pad(params["dec_bout"], ((0, 0), (0, pad_v)),
                   constant_values=-1e30).astype(f32)         # (1, Vp)
    emb_tbl = jnp.pad(params["dec_emb"], ((0, pad_v), (0, 0))).astype(bf16)

    cs = _pick_chunk(S)                                       # time-chunk sizes
    ct = _pick_chunk(T)
    cparams = pltpu.CompilerParams(dimension_semantics=("arbitrary",),
                                   vmem_limit_bytes=_vmem_limit_bytes())

    # ---------------- encoder: grid over S // cs ----------------
    enc_tm, h0, c0 = pl.pallas_call(
        encoder_kernel,
        out_shape=(jax.ShapeDtypeStruct((S, B, H), bf16),
                   jax.ShapeDtypeStruct((B, H), f32),
                   jax.ShapeDtypeStruct((B, H), f32)),
        grid_spec=pltpu.PrefetchScalarGridSpec(
            num_scalar_prefetch=0,
            grid=(S // cs,),
            in_specs=[pl.BlockSpec((cs, B, E), lambda s: (s, 0, 0)),
                      pl.BlockSpec((E, 4 * H), lambda s: (0, 0)),
                      pl.BlockSpec((H, 4 * H), lambda s: (0, 0)),
                      pl.BlockSpec((1, 4 * H), lambda s: (0, 0))],
            out_specs=(pl.BlockSpec((cs, B, H), lambda s: (s, 0, 0)),
                       pl.BlockSpec((B, H), lambda s: (0, 0)),
                       pl.BlockSpec((B, H), lambda s: (0, 0))),
            scratch_shapes=[pltpu.VMEM((B, H), f32),
                            pltpu.VMEM((B, H), f32)]),
        compiler_params=cparams,
    )(src_emb_tm, enc_wih, enc_whh, enc_b)

    # one-time batch-major relayout in the wrapper -> decoder keeps exactly
    # ONE bf16 copy of the encoder outputs resident (no in-kernel transpose).
    enc_bm = jnp.transpose(enc_tm, (1, 0, 2))                 # (B, S, H) bf16

    # per-step teacher-forcing flags (deterministic stand-in for the python
    # `random.random()` draw in the reference loop; shared across the batch)
    if key is None:
        key = jax.random.PRNGKey(0)
    use_tf = (jax.random.uniform(key, (T,)) < teacher_forcing_ratio
              ).astype(jnp.int32)

    # ---------------- decoder: grid over T // ct ----------------
    out_tm = pl.pallas_call(
        decoder_kernel,
        out_shape=jax.ShapeDtypeStruct((T, B, Vp), f32),
        grid_spec=pltpu.PrefetchScalarGridSpec(
            num_scalar_prefetch=1,                            # use_tf -> SMEM
            grid=(T // ct,),
            in_specs=[pl.BlockSpec((ct, B, E), lambda t, tf: (t, 0, 0)),   # trg emb
                      pl.BlockSpec((Vp, E), lambda t, tf: (0, 0)),         # emb tbl
                      pl.BlockSpec((B, S, H), lambda t, tf: (0, 0, 0)),    # enc (bf16)
                      pl.BlockSpec((B, 1), lambda t, tf: (0, 0)),          # src_len
                      pl.BlockSpec((B, H), lambda t, tf: (0, 0)),          # h0
                      pl.BlockSpec((B, H), lambda t, tf: (0, 0)),          # c0
                      pl.BlockSpec((E, 4 * H), lambda t, tf: (0, 0)),      # W_emb
                      pl.BlockSpec((H, 4 * H), lambda t, tf: (0, 0)),      # W_ctx
                      pl.BlockSpec((H, 4 * H), lambda t, tf: (0, 0)),      # W_h
                      pl.BlockSpec((1, 4 * H), lambda t, tf: (0, 0)),      # bias
                      pl.BlockSpec((H, Vp), lambda t, tf: (0, 0)),         # Wout_h
                      pl.BlockSpec((H, Vp), lambda t, tf: (0, 0)),         # Wout_c
                      pl.BlockSpec((1, Vp), lambda t, tf: (0, 0))],        # bout
            out_specs=pl.BlockSpec((ct, B, Vp), lambda t, tf: (t, 0, 0)),
            scratch_shapes=[pltpu.VMEM((B, H), f32),          # h
                            pltpu.VMEM((B, H), f32),          # c
                            pltpu.VMEM((B, E), bf16)]),       # next input emb
        compiler_params=cparams,
    )(use_tf, trg_emb_tm, emb_tbl, enc_bm,
      src_len.reshape(B, 1).astype(jnp.int32), h0, c0,
      dec_w_e, dec_w_c, dec_w_h, dec_b, wout_h, wout_c, bout)

    # (T, B, Vp) -> (B, T, V): strip the vocab padding in the wrapper.
    return jnp.transpose(out_tm, (1, 0, 2))[:, :, :V]


if __name__ == "__main__":
    key = jax.random.PRNGKey(0)
    # NOTE: for real MXU utilization B should be >= 8 (ideally >= 128); the
    # test shapes below just exercise correctness.
    B, S, T, E, H = 2, 8, 8, 16, 32
    V_SRC, V_TRG = 24, 32

    keys = jax.random.split(key, 16)

    def rnd(k, shape):
        return (0.1 * jax.random.normal(k, shape)).astype(jnp.float32)

    params = {
        "enc_emb":    rnd(keys[0], (V_SRC, E)),
        "enc_wih":    rnd(keys[1], (E, 4 * H)),
        "enc_whh":    rnd(keys[2], (H, 4 * H)),
        "enc_b":      rnd(keys[3], (1, 4 * H)),
        "dec_emb":    rnd(keys[4], (V_TRG, E)),
        "dec_wih_e":  rnd(keys[5], (E, 4 * H)),
        "dec_wih_c":  rnd(keys[6], (H, 4 * H)),
        "dec_whh":    rnd(keys[7], (H, 4 * H)),
        "dec_b":      rnd(keys[8], (1, 4 * H)),
        "dec_wout_h": rnd(keys[9], (H, V_TRG)),
        "dec_wout_c": rnd(keys[10], (H, V_TRG)),
        "dec_bout":   rnd(keys[11], (1, V_TRG)),
    }

    src = jax.random.randint(keys[12], (B, S), 0, V_SRC)
    trg = jax.random.randint(keys[13], (B, T), 0, V_TRG)
    src_len = jnp.array([S, S - 3], dtype=jnp.int32)

    out = seq2seq_forward(params, src, src_len, trg,
                          teacher_forcing_ratio=0.5, key=keys[14])
    out = jax.block_until_ready(out)

    assert out.shape == (B, T, V_TRG)
    assert bool(jnp.all(out[:, 0, :] == 0.0))   # outputs[:, 0, :] stays zero
    assert bool(jnp.all(jnp.isfinite(out)))
    print("KERNEL_OK")
</pallas_src>

<mosaic_0001>
module attributes {stable_mosaic.version = 11 : i64} {
  func.func @encoder_kernel(%arg0: i32, %arg1: memref<8x2x16xbf16, #tpu.memory_space<vmem>>, %arg2: memref<16x128xbf16, #tpu.memory_space<vmem>>, %arg3: memref<32x128xbf16, #tpu.memory_space<vmem>>, %arg4: memref<1x128xf32, #tpu.memory_space<vmem>>, %arg5: memref<8x2x32xbf16, #tpu.memory_space<vmem>>, %arg6: memref<2x32xf32, #tpu.memory_space<vmem>>, %arg7: memref<2x32xf32, #tpu.memory_space<vmem>>, %arg8: memref<2x32xf32, #tpu.memory_space<vmem>>, %arg9: memref<2x32xf32, #tpu.memory_space<vmem>>) attributes {dimension_semantics = [#tpu.dimension_semantics<arbitrary>], iteration_bounds = array<i64: 1>, scalar_prefetch = 0 : i64, scratch_operands = 2 : i64, tpu.core_type = #tpu.core_type<tc>, window_params = [{transform_indices = @transform_0, window_bounds = array<i64: 8, 2, 16>}, {pipeline_mode = #tpu.pipeline_mode<synchronous>, transform_indices = @transform_1, window_bounds = array<i64: 16, 128>}, {pipeline_mode = #tpu.pipeline_mode<synchronous>, transform_indices = @transform_2, window_bounds = array<i64: 32, 128>}, {pipeline_mode = #tpu.pipeline_mode<synchronous>, transform_indices = @transform_3, window_bounds = array<i64: 1, 128>}, {transform_indices = @transform_4, window_bounds = array<i64: 8, 2, 32>}, {pipeline_mode = #tpu.pipeline_mode<synchronous>, transform_indices = @transform_5, window_bounds = array<i64: 2, 32>}, {pipeline_mode = #tpu.pipeline_mode<synchronous>, transform_indices = @transform_6, window_bounds = array<i64: 2, 32>}]} {
    %c0_i32 = arith.constant 0 : i32
    %0 = arith.cmpi eq, %arg0, %c0_i32 : i32
    %1 = arith.extui %0 : i1 to i32
    %c0_i32_0 = arith.constant 0 : i32
    %2 = arith.cmpi ne, %1, %c0_i32_0 : i32
    scf.if %2 {
      %cst_88 = arith.constant 0.000000e+00 : f32
      %325 = vector.broadcast %cst_88 : f32 to vector<2x32xf32>
      %c0_89 = arith.constant 0 : index
      %c0_90 = arith.constant 0 : index
      %326 = vector.load %arg8[%c0_89, %c0_90] : memref<2x32xf32, #tpu.memory_space<vmem>>, vector<2x32xf32>
      tpu.vector_store %arg8[%c0_89, %c0_90], %325 {strides = array<i32>} : memref<2x32xf32, #tpu.memory_space<vmem>>, vector<2x32xf32>,
      %cst_91 = arith.constant 0.000000e+00 : f32
      %327 = vector.broadcast %cst_91 : f32 to vector<2x32xf32>
      %c0_92 = arith.constant 0 : index
      %c0_93 = arith.constant 0 : index
      %328 = vector.load %arg9[%c0_92, %c0_93] : memref<2x32xf32, #tpu.memory_space<vmem>>, vector<2x32xf32>
      tpu.vector_store %arg9[%c0_92, %c0_93], %327 {strides = array<i32>} : memref<2x32xf32, #tpu.memory_space<vmem>>, vector<2x32xf32>,
    } else {
    }
    %c0 = arith.constant 0 : index
    %c0_1 = arith.constant 0 : index
    %3 = vector.load %arg2[%c0, %c0_1] : memref<16x128xbf16, #tpu.memory_space<vmem>>, vector<16x128xbf16>
    %c0_2 = arith.constant 0 : index
    %c0_3 = arith.constant 0 : index
    %4 = vector.load %arg3[%c0_2, %c0_3] : memref<32x128xbf16, #tpu.memory_space<vmem>>, vector<32x128xbf16>
    %c0_4 = arith.constant 0 : index
    %c0_5 = arith.constant 0 : index
    %5 = vector.load %arg4[%c0_4, %c0_5] : memref<1x128xf32, #tpu.memory_space<vmem>>, vector<1x128xf32>
    %c0_6 = arith.constant 0 : index
    %c0_7 = arith.constant 0 : index
    %6 = vector.load %arg8[%c0_6, %c0_7] : memref<2x32xf32, #tpu.memory_space<vmem>>, vector<2x32xf32>
    %c0_8 = arith.constant 0 : index
    %c0_9 = arith.constant 0 : index
    %7 = vector.load %arg9[%c0_8, %c0_9] : memref<2x32xf32, #tpu.memory_space<vmem>>, vector<2x32xf32>
    %c0_i32_10 = arith.constant 0 : i32
    %8 = arith.index_cast %c0_i32_10 : i32 to index
    %c0_11 = arith.constant 0 : index
    %c0_12 = arith.constant 0 : index
    %9 = vector.load %arg1[%8, %c0_11, %c0_12] : memref<8x2x16xbf16, #tpu.memory_space<vmem>>, vector<1x2x16xbf16>
    %10 = vector.shape_cast %9 : vector<1x2x16xbf16> to vector<2x16xbf16>
    %cst = arith.constant dense<0.000000e+00> : vector<2x128xf32>
    %11 = tpu.matmul %10, %3, %cst {dimension_numbers = #tpu.dot_dimension_numbers<[1], [0], [0], [1], [0, 0, 1, 1], [], []>} : vector<2x16xbf16>, vector<16x128xbf16>, vector<2x128xf32> -> vector<2x128xf32>
    %12 = arith.truncf %6 : vector<2x32xf32> to vector<2x32xbf16>
    %cst_13 = arith.constant dense<0.000000e+00> : vector<2x128xf32>
    %13 = tpu.matmul %12, %4, %cst_13 {dimension_numbers = #tpu.dot_dimension_numbers<[1], [0], [0], [1], [0, 0, 1, 1], [], []>} : vector<2x32xbf16>, vector<32x128xbf16>, vector<2x128xf32> -> vector<2x128xf32>
    %14 = arith.addf %11, %13 : vector<2x128xf32>
    %15 = vector.broadcast %5 : vector<1x128xf32> to vector<2x128xf32>
    %16 = arith.addf %14, %15 : vector<2x128xf32>
    %17 = vector.extract_strided_slice %16 {offsets = [0, 0], sizes = [2, 32], strides = [1, 1]} : vector<2x128xf32> to vector<2x32xf32>
    %18 = arith.negf %17 : vector<2x32xf32>
    %19 = math.exp %18 : vector<2x32xf32>
    %cst_14 = arith.constant 1.000000e+00 : f32
    %20 = vector.broadcast %cst_14 : f32 to vector<2x32xf32>
    %21 = arith.addf %20, %19 : vector<2x32xf32>
    %22 = arith.divf %20, %21 : vector<2x32xf32>
    %23 = vector.extract_strided_slice %16 {offsets = [0, 32], sizes = [2, 32], strides = [1, 1]} : vector<2x128xf32> to vector<2x32xf32>
    %24 = arith.negf %23 : vector<2x32xf32>
    %25 = math.exp %24 : vector<2x32xf32>
    %cst_15 = arith.constant 1.000000e+00 : f32
    %26 = vector.broadcast %cst_15 : f32 to vector<2x32xf32>
    %27 = arith.addf %26, %25 : vector<2x32xf32>
    %28 = arith.divf %26, %27 : vector<2x32xf32>
    %29 = vector.extract_strided_slice %16 {offsets = [0, 64], sizes = [2, 32], strides = [1, 1]} : vector<2x128xf32> to vector<2x32xf32>
    %30 = math.tanh %29 : vector<2x32xf32>
    %31 = vector.extract_strided_slice %16 {offsets = [0, 96], sizes = [2, 32], strides = [1, 1]} : vector<2x128xf32> to vector<2x32xf32>
    %32 = arith.negf %31 : vector<2x32xf32>
    %33 = math.exp %32 : vector<2x32xf32>
    %cst_16 = arith.constant 1.000000e+00 : f32
    %34 = vector.broadcast %cst_16 : f32 to vector<2x32xf32>
    %35 = arith.addf %34, %33 : vector<2x32xf32>
    %36 = arith.divf %34, %35 : vector<2x32xf32>
    %37 = arith.mulf %28, %7 : vector<2x32xf32>
    %38 = arith.mulf %22, %30 : vector<2x32xf32>
    %39 = arith.addf %37, %38 : vector<2x32xf32>
    %40 = math.tanh %39 : vector<2x32xf32>
    %41 = arith.mulf %36, %40 : vector<2x32xf32>
    %42 = arith.truncf %41 : vector<2x32xf32> to vector<2x32xbf16>
    %43 = arith.index_cast %c0_i32_10 : i32 to index
    %c0_17 = arith.constant 0 : index
    %c0_18 = arith.constant 0 : index
    %44 = vector.load %arg5[%43, %c0_17, %c0_18] : memref<8x2x32xbf16, #tpu.memory_space<vmem>>, vector<1x2x32xbf16>
    %45 = vector.shape_cast %44 : vector<1x2x32xbf16> to vector<2x32xbf16>
    %46 = vector.shape_cast %42 : vector<2x32xbf16> to vector<1x2x32xbf16>
    tpu.vector_store %arg5[%43, %c0_17, %c0_18], %46 {strides = array<i32>} : memref<8x2x32xbf16, #tpu.memory_space<vmem>>, vector<1x2x32xbf16>,
    %c1_i32 = arith.constant 1 : i32
    %47 = arith.index_cast %c1_i32 : i32 to index
    %c0_19 = arith.constant 0 : index
    %c0_20 = arith.constant 0 : index
    %48 = vector.load %arg1[%47, %c0_19, %c0_20] : memref<8x2x16xbf16, #tpu.memory_space<vmem>>, vector<1x2x16xbf16>
    %49 = vector.shape_cast %48 : vector<1x2x16xbf16> to vector<2x16xbf16>
    %cst_21 = arith.constant dense<0.000000e+00> : vector<2x128xf32>
    %50 = tpu.matmul %49, %3, %cst_21 {dimension_numbers = #tpu.dot_dimension_numbers<[1], [0], [0], [1], [0, 0, 1, 1], [], []>} : vector<2x16xbf16>, vector<16x128xbf16>, vector<2x128xf32> -> vector<2x128xf32>
    %51 = arith.truncf %41 : vector<2x32xf32> to vector<2x32xbf16>
    %cst_22 = arith.constant dense<0.000000e+00> : vector<2x128xf32>
    %52 = tpu.matmul %51, %4, %cst_22 {dimension_numbers = #tpu.dot_dimension_numbers<[1], [0], [0], [1], [0, 0, 1, 1], [], []>} : vector<2x32xbf16>, vector<32x128xbf16>, vector<2x128xf32> -> vector<2x128xf32>
    %53 = arith.addf %50, %52 : vector<2x128xf32>
    %54 = vector.broadcast %5 : vector<1x128xf32> to vector<2x128xf32>
    %55 = arith.addf %53, %54 : vector<2x128xf32>
    %56 = vector.extract_strided_slice %55 {offsets = [0, 0], sizes = [2, 32], strides = [1, 1]} : vector<2x128xf32> to vector<2x32xf32>
    %57 = arith.negf %56 : vector<2x32xf32>
    %58 = math.exp %57 : vector<2x32xf32>
    %cst_23 = arith.constant 1.000000e+00 : f32
    %59 = vector.broadcast %cst_23 : f32 to vector<2x32xf32>
    %60 = arith.addf %59, %58 : vector<2x32xf32>
    %61 = arith.divf %59, %60 : vector<2x32xf32>
    %62 = vector.extract_strided_slice %55 {offsets = [0, 32], sizes = [2, 32], strides = [1, 1]} : vector<2x128xf32> to vector<2x32xf32>
    %63 = arith.negf %62 : vector<2x32xf32>
    %64 = math.exp %63 : vector<2x32xf32>
    %cst_24 = arith.constant 1.000000e+00 : f32
    %65 = vector.broadcast %cst_24 : f32 to vector<2x32xf32>
    %66 = arith.addf %65, %64 : vector<2x32xf32>
    %67 = arith.divf %65, %66 : vector<2x32xf32>
    %68 = vector.extract_strided_slice %55 {offsets = [0, 64], sizes = [2, 32], strides = [1, 1]} : vector<2x128xf32> to vector<2x32xf32>
    %69 = math.tanh %68 : vector<2x32xf32>
    %70 = vector.extract_strided_slice %55 {offsets = [0, 96], sizes = [2, 32], strides = [1, 1]} : vector<2x128xf32> to vector<2x32xf32>
    %71 = arith.negf %70 : vector<2x32xf32>
    %72 = math.exp %71 : vector<2x32xf32>
    %cst_25 = arith.constant 1.000000e+00 : f32
    %73 = vector.broadcast %cst_25 : f32 to vector<2x32xf32>
    %74 = arith.addf %73, %72 : vector<2x32xf32>
    %75 = arith.divf %73, %74 : vector<2x32xf32>
    %76 = arith.mulf %67, %39 : vector<2x32xf32>
    %77 = arith.mulf %61, %69 : vector<2x32xf32>
    %78 = arith.addf %76, %77 : vector<2x32xf32>
    %79 = math.tanh %78 : vector<2x32xf32>
    %80 = arith.mulf %75, %79 : vector<2x32xf32>
    %81 = arith.truncf %80 : vector<2x32xf32> to vector<2x32xbf16>
    %82 = arith.index_cast %c1_i32 : i32 to index
    %c0_26 = arith.constant 0 : index
    %c0_27 = arith.constant 0 : index
    %83 = vector.load %arg5[%82, %c0_26, %c0_27] : memref<8x2x32xbf16, #tpu.memory_space<vmem>>, vector<1x2x32xbf16>
    %84 = vector.shape_cast %83 : vector<1x2x32xbf16> to vector<2x32xbf16>
    %85 = vector.shape_cast %81 : vector<2x32xbf16> to vector<1x2x32xbf16>
    tpu.vector_store %arg5[%82, %c0_26, %c0_27], %85 {strides = array<i32>} : memref<8x2x32xbf16, #tpu.memory_space<vmem>>, vector<1x2x32xbf16>,
    %c2_i32 = arith.constant 2 : i32
    %86 = arith.index_cast %c2_i32 : i32 to index
    %c0_28 = arith.constant 0 : index
    %c0_29 = arith.constant 0 : index
    %87 = vector.load %arg1[%86, %c0_28, %c0_29] : memref<8x2x16xbf16, #tpu.memory_space<vmem>>, vector<1x2x16xbf16>
    %88 = vector.shape_cast %87 : vector<1x2x16xbf16> to vector<2x16xbf16>
    %cst_30 = arith.constant dense<0.000000e+00> : vector<2x128xf32>
    %89 = tpu.matmul %88, %3, %cst_30 {dimension_numbers = #tpu.dot_dimension_numbers<[1], [0], [0], [1], [0, 0, 1, 1], [], []>} : vector<2x16xbf16>, vector<16x128xbf16>, vector<2x128xf32> -> vector<2x128xf32>
    %90 = arith.truncf %80 : vector<2x32xf32> to vector<2x32xbf16>
    %cst_31 = arith.constant dense<0.000000e+00> : vector<2x128xf32>
    %91 = tpu.matmul %90, %4, %cst_31 {dimension_numbers = #tpu.dot_dimension_numbers<[1], [0], [0], [1], [0, 0, 1, 1], [], []>} : vector<2x32xbf16>, vector<32x128xbf16>, vector<2x128xf32> -> vector<2x128xf32>
    %92 = arith.addf %89, %91 : vector<2x128xf32>
    %93 = vector.broadcast %5 : vector<1x128xf32> to vector<2x128xf32>
    %94 = arith.addf %92, %93 : vector<2x128xf32>
    %95 = vector.extract_strided_slice %94 {offsets = [0, 0], sizes = [2, 32], strides = [1, 1]} : vector<2x128xf32> to vector<2x32xf32>
    %96 = arith.negf %95 : vector<2x32xf32>
    %97 = math.exp %96 : vector<2x32xf32>
    %cst_32 = arith.constant 1.000000e+00 : f32
    %98 = vector.broadcast %cst_32 : f32 to vector<2x32xf32>
    %99 = arith.addf %98, %97 : vector<2x32xf32>
    %100 = arith.divf %98, %99 : vector<2x32xf32>
    %101 = vector.extract_strided_slice %94 {offsets = [0, 32], sizes = [2, 32], strides = [1, 1]} : vector<2x128xf32> to vector<2x32xf32>
    %102 = arith.negf %101 : vector<2x32xf32>
    %103 = math.exp %102 : vector<2x32xf32>
    %cst_33 = arith.constant 1.000000e+00 : f32
    %104 = vector.broadcast %cst_33 : f32 to vector<2x32xf32>
    %105 = arith.addf %104, %103 : vector<2x32xf32>
    %106 = arith.divf %104, %105 : vector<2x32xf32>
    %107 = vector.extract_strided_slice %94 {offsets = [0, 64], sizes = [2, 32], strides = [1, 1]} : vector<2x128xf32> to vector<2x32xf32>
    %108 = math.tanh %107 : vector<2x32xf32>
    %109 = vector.extract_strided_slice %94 {offsets = [0, 96], sizes = [2, 32], strides = [1, 1]} : vector<2x128xf32> to vector<2x32xf32>
    %110 = arith.negf %109 : vector<2x32xf32>
    %111 = math.exp %110 : vector<2x32xf32>
    %cst_34 = arith.constant 1.000000e+00 : f32
    %112 = vector.broadcast %cst_34 : f32 to vector<2x32xf32>
    %113 = arith.addf %112, %111 : vector<2x32xf32>
    %114 = arith.divf %112, %113 : vector<2x32xf32>
    %115 = arith.mulf %106, %78 : vector<2x32xf32>
    %116 = arith.mulf %100, %108 : vector<2x32xf32>
    %117 = arith.addf %115, %116 : vector<2x32xf32>
    %118 = math.tanh %117 : vector<2x32xf32>
    %119 = arith.mulf %114, %118 : vector<2x32xf32>
    %120 = arith.truncf %119 : vector<2x32xf32> to vector<2x32xbf16>
    %121 = arith.index_cast %c2_i32 : i32 to index
    %c0_35 = arith.constant 0 : index
    %c0_36 = arith.constant 0 : index
    %122 = vector.load %arg5[%121, %c0_35, %c0_36] : memref<8x2x32xbf16, #tpu.memory_space<vmem>>, vector<1x2x32xbf16>
    %123 = vector.shape_cast %122 : vector<1x2x32xbf16> to vector<2x32xbf16>
    %124 = vector.shape_cast %120 : vector<2x32xbf16> to vector<1x2x32xbf16>
    tpu.vector_store %arg5[%121, %c0_35, %c0_36], %124 {strides = array<i32>} : memref<8x2x32xbf16, #tpu.memory_space<vmem>>, vector<1x2x32xbf16>,
    %c3_i32 = arith.constant 3 : i32
    %125 = arith.index_cast %c3_i32 : i32 to index
    %c0_37 = arith.constant 0 : index
    %c0_38 = arith.constant 0 : index
    %126 = vector.load %arg1[%125, %c0_37, %c0_38] : memref<8x2x16xbf16, #tpu.memory_space<vmem>>, vector<1x2x16xbf16>
    %127 = vector.shape_cast %126 : vector<1x2x16xbf16> to vector<2x16xbf16>
    %cst_39 = arith.constant dense<0.000000e+00> : vector<2x128xf32>
    %128 = tpu.matmul %127, %3, %cst_39 {dimension_numbers = #tpu.dot_dimension_numbers<[1], [0], [0], [1], [0, 0, 1, 1], [], []>} : vector<2x16xbf16>, vector<16x128xbf16>, vector<2x128xf32> -> vector<2x128xf32>
    %129 = arith.truncf %119 : vector<2x32xf32> to vector<2x32xbf16>
    %cst_40 = arith.constant dense<0.000000e+00> : vector<2x128xf32>
    %130 = tpu.matmul %129, %4, %cst_40 {dimension_numbers = #tpu.dot_dimension_numbers<[1], [0], [0], [1], [0, 0, 1, 1], [], []>} : vector<2x32xbf16>, vector<32x128xbf16>, vector<2x128xf32> -> vector<2x128xf32>
    %131 = arith.addf %128, %130 : vector<2x128xf32>
    %132 = vector.broadcast %5 : vector<1x128xf32> to vector<2x128xf32>
    %133 = arith.addf %131, %132 : vector<2x128xf32>
    %134 = vector.extract_strided_slice %133 {offsets = [0, 0], sizes = [2, 32], strides = [1, 1]} : vector<2x128xf32> to vector<2x32xf32>
    %135 = arith.negf %134 : vector<2x32xf32>
    %136 = math.exp %135 : vector<2x32xf32>
    %cst_41 = arith.constant 1.000000e+00 : f32
    %137 = vector.broadcast %cst_41 : f32 to vector<2x32xf32>
    %138 = arith.addf %137, %136 : vector<2x32xf32>
    %139 = arith.divf %137, %138 : vector<2x32xf32>
    %140 = vector.extract_strided_slice %133 {offsets = [0, 32], sizes = [2, 32], strides = [1, 1]} : vector<2x128xf32> to vector<2x32xf32>
    %141 = arith.negf %140 : vector<2x32xf32>
    %142 = math.exp %141 : vector<2x32xf32>
    %cst_42 = arith.constant 1.000000e+00 : f32
    %143 = vector.broadcast %cst_42 : f32 to vector<2x32xf32>
    %144 = arith.addf %143, %142 : vector<2x32xf32>
    %145 = arith.divf %143, %144 : vector<2x32xf32>
    %146 = vector.extract_strided_slice %133 {offsets = [0, 64], sizes = [2, 32], strides = [1, 1]} : vector<2x128xf32> to vector<2x32xf32>
    %147 = math.tanh %146 : vector<2x32xf32>
    %148 = vector.extract_strided_slice %133 {offsets = [0, 96], sizes = [2, 32], strides = [1, 1]} : vector<2x128xf32> to vector<2x32xf32>
    %149 = arith.negf %148 : vector<2x32xf32>
    %150 = math.exp %149 : vector<2x32xf32>
    %cst_43 = arith.constant 1.000000e+00 : f32
    %151 = vector.broadcast %cst_43 : f32 to vector<2x32xf32>
    %152 = arith.addf %151, %150 : vector<2x32xf32>
    %153 = arith.divf %151, %152 : vector<2x32xf32>
    %154 = arith.mulf %145, %117 : vector<2x32xf32>
    %155 = arith.mulf %139, %147 : vector<2x32xf32>
    %156 = arith.addf %154, %155 : vector<2x32xf32>
    %157 = math.tanh %156 : vector<2x32xf32>
    %158 = arith.mulf %153, %157 : vector<2x32xf32>
    %159 = arith.truncf %158 : vector<2x32xf32> to vector<2x32xbf16>
    %160 = arith.index_cast %c3_i32 : i32 to index
    %c0_44 = arith.constant 0 : index
    %c0_45 = arith.constant 0 : index
    %161 = vector.load %arg5[%160, %c0_44, %c0_45] : memref<8x2x32xbf16, #tpu.memory_space<vmem>>, vector<1x2x32xbf16>
    %162 = vector.shape_cast %161 : vector<1x2x32xbf16> to vector<2x32xbf16>
    %163 = vector.shape_cast %159 : vector<2x32xbf16> to vector<1x2x32xbf16>
    tpu.vector_store %arg5[%160, %c0_44, %c0_45], %163 {strides = array<i32>} : memref<8x2x32xbf16, #tpu.memory_space<vmem>>, vector<1x2x32xbf16>,
    %c4_i32 = arith.constant 4 : i32
    %164 = arith.index_cast %c4_i32 : i32 to index
    %c0_46 = arith.constant 0 : index
    %c0_47 = arith.constant 0 : index
    %165 = vector.load %arg1[%164, %c0_46, %c0_47] : memref<8x2x16xbf16, #tpu.memory_space<vmem>>, vector<1x2x16xbf16>
    %166 = vector.shape_cast %165 : vector<1x2x16xbf16> to vector<2x16xbf16>
    %cst_48 = arith.constant dense<0.000000e+00> : vector<2x128xf32>
    %167 = tpu.matmul %166, %3, %cst_48 {dimension_numbers = #tpu.dot_dimension_numbers<[1], [0], [0], [1], [0, 0, 1, 1], [], []>} : vector<2x16xbf16>, vector<16x128xbf16>, vector<2x128xf32> -> vector<2x128xf32>
    %168 = arith.truncf %158 : vector<2x32xf32> to vector<2x32xbf16>
    %cst_49 = arith.constant dense<0.000000e+00> : vector<2x128xf32>
    %169 = tpu.matmul %168, %4, %cst_49 {dimension_numbers = #tpu.dot_dimension_numbers<[1], [0], [0], [1], [0, 0, 1, 1], [], []>} : vector<2x32xbf16>, vector<32x128xbf16>, vector<2x128xf32> -> vector<2x128xf32>
    %170 = arith.addf %167, %169 : vector<2x128xf32>
    %171 = vector.broadcast %5 : vector<1x128xf32> to vector<2x128xf32>
    %172 = arith.addf %170, %171 : vector<2x128xf32>
    %173 = vector.extract_strided_slice %172 {offsets = [0, 0], sizes = [2, 32], strides = [1, 1]} : vector<2x128xf32> to vector<2x32xf32>
    %174 = arith.negf %173 : vector<2x32xf32>
    %175 = math.exp %174 : vector<2x32xf32>
    %cst_50 = arith.constant 1.000000e+00 : f32
    %176 = vector.broadcast %cst_50 : f32 to vector<2x32xf32>
    %177 = arith.addf %176, %175 : vector<2x32xf32>
    %178 = arith.divf %176, %177 : vector<2x32xf32>
    %179 = vector.extract_strided_slice %172 {offsets = [0, 32], sizes = [2, 32], strides = [1, 1]} : vector<2x128xf32> to vector<2x32xf32>
    %180 = arith.negf %179 : vector<2x32xf32>
    %181 = math.exp %180 : vector<2x32xf32>
    %cst_51 = arith.constant 1.000000e+00 : f32
    %182 = vector.broadcast %cst_51 : f32 to vector<2x32xf32>
    %183 = arith.addf %182, %181 : vector<2x32xf32>
    %184 = arith.divf %182, %183 : vector<2x32xf32>
    %185 = vector.extract_strided_slice %172 {offsets = [0, 64], sizes = [2, 32], strides = [1, 1]} : vector<2x128xf32> to vector<2x32xf32>
    %186 = math.tanh %185 : vector<2x32xf32>
    %187 = vector.extract_strided_slice %172 {offsets = [0, 96], sizes = [2, 32], strides = [1, 1]} : vector<2x128xf32> to vector<2x32xf32>
    %188 = arith.negf %187 : vector<2x32xf32>
    %189 = math.exp %188 : vector<2x32xf32>
    %cst_52 = arith.constant 1.000000e+00 : f32
    %190 = vector.broadcast %cst_52 : f32 to vector<2x32xf32>
    %191 = arith.addf %190, %189 : vector<2x32xf32>
    %192 = arith.divf %190, %191 : vector<2x32xf32>
    %193 = arith.mulf %184, %156 : vector<2x32xf32>
    %194 = arith.mulf %178, %186 : vector<2x32xf32>
    %195 = arith.addf %193, %194 : vector<2x32xf32>
    %196 = math.tanh %195 : vector<2x32xf32>
    %197 = arith.mulf %192, %196 : vector<2x32xf32>
    %198 = arith.truncf %197 : vector<2x32xf32> to vector<2x32xbf16>
    %199 = arith.index_cast %c4_i32 : i32 to index
    %c0_53 = arith.constant 0 : index
    %c0_54 = arith.constant 0 : index
    %200 = vector.load %arg5[%199, %c0_53, %c0_54] : memref<8x2x32xbf16, #tpu.memory_space<vmem>>, vector<1x2x32xbf16>
    %201 = vector.shape_cast %200 : vector<1x2x32xbf16> to vector<2x32xbf16>
    %202 = vector.shape_cast %198 : vector<2x32xbf16> to vector<1x2x32xbf16>
    tpu.vector_store %arg5[%199, %c0_53, %c0_54], %202 {strides = array<i32>} : memref<8x2x32xbf16, #tpu.memory_space<vmem>>, vector<1x2x32xbf16>,
    %c5_i32 = arith.constant 5 : i32
    %203 = arith.index_cast %c5_i32 : i32 to index
    %c0_55 = arith.constant 0 : index
    %c0_56 = arith.constant 0 : index
    %204 = vector.load %arg1[%203, %c0_55, %c0_56] : memref<8x2x16xbf16, #tpu.memory_space<vmem>>, vector<1x2x16xbf16>
    %205 = vector.shape_cast %204 : vector<1x2x16xbf16> to vector<2x16xbf16>
    %cst_57 = arith.constant dense<0.000000e+00> : vector<2x128xf32>
    %206 = tpu.matmul %205, %3, %cst_57 {dimension_numbers = #tpu.dot_dimension_numbers<[1], [0], [0], [1], [0, 0, 1, 1], [], []>} : vector<2x16xbf16>, vector<16x128xbf16>, vector<2x128xf32> -> vector<2x128xf32>
    %207 = arith.truncf %197 : vector<2x32xf32> to vector<2x32xbf16>
    %cst_58 = arith.constant dense<0.000000e+00> : vector<2x128xf32>
    %208 = tpu.matmul %207, %4, %cst_58 {dimension_numbers = #tpu.dot_dimension_numbers<[1], [0], [0], [1], [0, 0, 1, 1], [], []>} : vector<2x32xbf16>, vector<32x128xbf16>, vector<2x128xf32> -> vector<2x128xf32>
    %209 = arith.addf %206, %208 : vector<2x128xf32>
    %210 = vector.broadcast %5 : vector<1x128xf32> to vector<2x128xf32>
    %211 = arith.addf %209, %210 : vector<2x128xf32>
    %212 = vector.extract_strided_slice %211 {offsets = [0, 0], sizes = [2, 32], strides = [1, 1]} : vector<2x128xf32> to vector<2x32xf32>
    %213 = arith.negf %212 : vector<2x32xf32>
    %214 = math.exp %213 : vector<2x32xf32>
    %cst_59 = arith.constant 1.000000e+00 : f32
    %215 = vector.broadcast %cst_59 : f32 to vector<2x32xf32>
    %216 = arith.addf %215, %214 : vector<2x32xf32>
    %217 = arith.divf %215, %216 : vector<2x32xf32>
    %218 = vector.extract_strided_slice %211 {offsets = [0, 32], sizes = [2, 32], strides = [1, 1]} : vector<2x128xf32> to vector<2x32xf32>
    %219 = arith.negf %218 : vector<2x32xf32>
    %220 = math.exp %219 : vector<2x32xf32>
    %cst_60 = arith.constant 1.000000e+00 : f32
    %221 = vector.broadcast %cst_60 : f32 to vector<2x32xf32>
    %222 = arith.addf %221, %220 : vector<2x32xf32>
    %223 = arith.divf %221, %222 : vector<2x32xf32>
    %224 = vector.extract_strided_slice %211 {offsets = [0, 64], sizes = [2, 32], strides = [1, 1]} : vector<2x128xf32> to vector<2x32xf32>
    %225 = math.tanh %224 : vector<2x32xf32>
    %226 = vector.extract_strided_slice %211 {offsets = [0, 96], sizes = [2, 32], strides = [1, 1]} : vector<2x128xf32> to vector<2x32xf32>
    %227 = arith.negf %226 : vector<2x32xf32>
    %228 = math.exp %227 : vector<2x32xf32>
    %cst_61 = arith.constant 1.000000e+00 : f32
    %229 = vector.broadcast %cst_61 : f32 to vector<2x32xf32>
    %230 = arith.addf %229, %228 : vector<2x32xf32>
    %231 = arith.divf %229, %230 : vector<2x32xf32>
    %232 = arith.mulf %223, %195 : vector<2x32xf32>
    %233 = arith.mulf %217, %225 : vector<2x32xf32>
    %234 = arith.addf %232, %233 : vector<2x32xf32>
    %235 = math.tanh %234 : vector<2x32xf32>
    %236 = arith.mulf %231, %235 : vector<2x32xf32>
    %237 = arith.truncf %236 : vector<2x32xf32> to vector<2x32xbf16>
    %238 = arith.index_cast %c5_i32 : i32 to index
    %c0_62 = arith.constant 0 : index
    %c0_63 = arith.constant 0 : index
    %239 = vector.load %arg5[%238, %c0_62, %c0_63] : memref<8x2x32xbf16, #tpu.memory_space<vmem>>, vector<1x2x32xbf16>
    %240 = vector.shape_cast %239 : vector<1x2x32xbf16> to vector<2x32xbf16>
    %241 = vector.shape_cast %237 : vector<2x32xbf16> to vector<1x2x32xbf16>
    tpu.vector_store %arg5[%238, %c0_62, %c0_63], %241 {strides = array<i32>} : memref<8x2x32xbf16, #tpu.memory_space<vmem>>, vector<1x2x32xbf16>,
    %c6_i32 = arith.constant 6 : i32
    %242 = arith.index_cast %c6_i32 : i32 to index
    %c0_64 = arith.constant 0 : index
    %c0_65 = arith.constant 0 : index
    %243 = vector.load %arg1[%242, %c0_64, %c0_65] : memref<8x2x16xbf16, #tpu.memory_space<vmem>>, vector<1x2x16xbf16>
    %244 = vector.shape_cast %243 : vector<1x2x16xbf16> to vector<2x16xbf16>
    %cst_66 = arith.constant dense<0.000000e+00> : vector<2x128xf32>
    %245 = tpu.matmul %244, %3, %cst_66 {dimension_numbers = #tpu.dot_dimension_numbers<[1], [0], [0], [1], [0, 0, 1, 1], [], []>} : vector<2x16xbf16>, vector<16x128xbf16>, vector<2x128xf32> -> vector<2x128xf32>
    %246 = arith.truncf %236 : vector<2x32xf32> to vector<2x32xbf16>
    %cst_67 = arith.constant dense<0.000000e+00> : vector<2x128xf32>
    %247 = tpu.matmul %246, %4, %cst_67 {dimension_numbers = #tpu.dot_dimension_numbers<[1], [0], [0], [1], [0, 0, 1, 1], [], []>} : vector<2x32xbf16>, vector<32x128xbf16>, vector<2x128xf32> -> vector<2x128xf32>
    %248 = arith.addf %245, %247 : vector<2x128xf32>
    %249 = vector.broadcast %5 : vector<1x128xf32> to vector<2x128xf32>
    %250 = arith.addf %248, %249 : vector<2x128xf32>
    %251 = vector.extract_strided_slice %250 {offsets = [0, 0], sizes = [2, 32], strides = [1, 1]} : vector<2x128xf32> to vector<2x32xf32>
    %252 = arith.negf %251 : vector<2x32xf32>
    %253 = math.exp %252 : vector<2x32xf32>
    %cst_68 = arith.constant 1.000000e+00 : f32
    %254 = vector.broadcast %cst_68 : f32 to vector<2x32xf32>
    %255 = arith.addf %254, %253 : vector<2x32xf32>
    %256 = arith.divf %254, %255 : vector<2x32xf32>
    %257 = vector.extract_strided_slice %250 {offsets = [0, 32], sizes = [2, 32], strides = [1, 1]} : vector<2x128xf32> to vector<2x32xf32>
    %258 = arith.negf %257 : vector<2x32xf32>
    %259 = math.exp %258 : vector<2x32xf32>
    %cst_69 = arith.constant 1.000000e+00 : f32
    %260 = vector.broadcast %cst_69 : f32 to vector<2x32xf32>
    %261 = arith.addf %260, %259 : vector<2x32xf32>
    %262 = arith.divf %260, %261 : vector<2x32xf32>
    %263 = vector.extract_strided_slice %250 {offsets = [0, 64], sizes = [2, 32], strides = [1, 1]} : vector<2x128xf32> to vector<2x32xf32>
    %264 = math.tanh %263 : vector<2x32xf32>
    %265 = vector.extract_strided_slice %250 {offsets = [0, 96], sizes = [2, 32], strides = [1, 1]} : vector<2x128xf32> to vector<2x32xf32>
    %266 = arith.negf %265 : vector<2x32xf32>
    %267 = math.exp %266 : vector<2x32xf32>
    %cst_70 = arith.constant 1.000000e+00 : f32
    %268 = vector.broadcast %cst_70 : f32 to vector<2x32xf32>
    %269 = arith.addf %268, %267 : vector<2x32xf32>
    %270 = arith.divf %268, %269 : vector<2x32xf32>
    %271 = arith.mulf %262, %234 : vector<2x32xf32>
    %272 = arith.mulf %256, %264 : vector<2x32xf32>
    %273 = arith.addf %271, %272 : vector<2x32xf32>
    %274 = math.tanh %273 : vector<2x32xf32>
    %275 = arith.mulf %270, %274 : vector<2x32xf32>
    %276 = arith.truncf %275 : vector<2x32xf32> to vector<2x32xbf16>
    %277 = arith.index_cast %c6_i32 : i32 to index
    %c0_71 = arith.constant 0 : index
    %c0_72 = arith.constant 0 : index
    %278 = vector.load %arg5[%277, %c0_71, %c0_72] : memref<8x2x32xbf16, #tpu.memory_space<vmem>>, vector<1x2x32xbf16>
    %279 = vector.shape_cast %278 : vector<1x2x32xbf16> to vector<2x32xbf16>
    %280 = vector.shape_cast %276 : vector<2x32xbf16> to vector<1x2x32xbf16>
    tpu.vector_store %arg5[%277, %c0_71, %c0_72], %280 {strides = array<i32>} : memref<8x2x32xbf16, #tpu.memory_space<vmem>>, vector<1x2x32xbf16>,
    %c7_i32 = arith.constant 7 : i32
    %281 = arith.index_cast %c7_i32 : i32 to index
    %c0_73 = arith.constant 0 : index
    %c0_74 = arith.constant 0 : index
    %282 = vector.load %arg1[%281, %c0_73, %c0_74] : memref<8x2x16xbf16, #tpu.memory_space<vmem>>, vector<1x2x16xbf16>
    %283 = vector.shape_cast %282 : vector<1x2x16xbf16> to vector<2x16xbf16>
    %cst_75 = arith.constant dense<0.000000e+00> : vector<2x128xf32>
    %284 = tpu.matmul %283, %3, %cst_75 {dimension_numbers = #tpu.dot_dimension_numbers<[1], [0], [0], [1], [0, 0, 1, 1], [], []>} : vector<2x16xbf16>, vector<16x128xbf16>, vector<2x128xf32> -> vector<2x128xf32>
    %285 = arith.truncf %275 : vector<2x32xf32> to vector<2x32xbf16>
    %cst_76 = arith.constant dense<0.000000e+00> : vector<2x128xf32>
    %286 = tpu.matmul %285, %4, %cst_76 {dimension_numbers = #tpu.dot_dimension_numbers<[1], [0], [0], [1], [0, 0, 1, 1], [], []>} : vector<2x32xbf16>, vector<32x128xbf16>, vector<2x128xf32> -> vector<2x128xf32>
    %287 = arith.addf %284, %286 : vector<2x128xf32>
    %288 = vector.broadcast %5 : vector<1x128xf32> to vector<2x128xf32>
    %289 = arith.addf %287, %288 : vector<2x128xf32>
    %290 = vector.extract_strided_slice %289 {offsets = [0, 0], sizes = [2, 32], strides = [1, 1]} : vector<2x128xf32> to vector<2x32xf32>
    %291 = arith.negf %290 : vector<2x32xf32>
    %292 = math.exp %291 : vector<2x32xf32>
    %cst_77 = arith.constant 1.000000e+00 : f32
    %293 = vector.broadcast %cst_77 : f32 to vector<2x32xf32>
    %294 = arith.addf %293, %292 : vector<2x32xf32>
    %295 = arith.divf %293, %294 : vector<2x32xf32>
    %296 = vector.extract_strided_slice %289 {offsets = [0, 32], sizes = [2, 32], strides = [1, 1]} : vector<2x128xf32> to vector<2x32xf32>
    %297 = arith.negf %296 : vector<2x32xf32>
    %298 = math.exp %297 : vector<2x32xf32>
    %cst_78 = arith.constant 1.000000e+00 : f32
    %299 = vector.broadcast %cst_78 : f32 to vector<2x32xf32>
    %300 = arith.addf %299, %298 : vector<2x32xf32>
    %301 = arith.divf %299, %300 : vector<2x32xf32>
    %302 = vector.extract_strided_slice %289 {offsets = [0, 64], sizes = [2, 32], strides = [1, 1]} : vector<2x128xf32> to vector<2x32xf32>
    %303 = math.tanh %302 : vector<2x32xf32>
    %304 = vector.extract_strided_slice %289 {offsets = [0, 96], sizes = [2, 32], strides = [1, 1]} : vector<2x128xf32> to vector<2x32xf32>
    %305 = arith.negf %304 : vector<2x32xf32>
    %306 = math.exp %305 : vector<2x32xf32>
    %cst_79 = arith.constant 1.000000e+00 : f32
    %307 = vector.broadcast %cst_79 : f32 to vector<2x32xf32>
    %308 = arith.addf %307, %306 : vector<2x32xf32>
    %309 = arith.divf %307, %308 : vector<2x32xf32>
    %310 = arith.mulf %301, %273 : vector<2x32xf32>
    %311 = arith.mulf %295, %303 : vector<2x32xf32>
    %312 = arith.addf %310, %311 : vector<2x32xf32>
    %313 = math.tanh %312 : vector<2x32xf32>
    %314 = arith.mulf %309, %313 : vector<2x32xf32>
    %315 = arith.truncf %314 : vector<2x32xf32> to vector<2x32xbf16>
    %316 = arith.index_cast %c7_i32 : i32 to index
    %c0_80 = arith.constant 0 : index
    %c0_81 = arith.constant 0 : index
    %317 = vector.load %arg5[%316, %c0_80, %c0_81] : memref<8x2x32xbf16, #tpu.memory_space<vmem>>, vector<1x2x32xbf16>
    %318 = vector.shape_cast %317 : vector<1x2x32xbf16> to vector<2x32xbf16>
    %319 = vector.shape_cast %315 : vector<2x32xbf16> to vector<1x2x32xbf16>
    tpu.vector_store %arg5[%316, %c0_80, %c0_81], %319 {strides = array<i32>} : memref<8x2x32xbf16, #tpu.memory_space<vmem>>, vector<1x2x32xbf16>,
    %c8_i32 = arith.constant 8 : i32
    %c0_82 = arith.constant 0 : index
    %c0_83 = arith.constant 0 : index
    %320 = vector.load %arg8[%c0_82, %c0_83] : memref<2x32xf32, #tpu.memory_space<vmem>>, vector<2x32xf32>
    tpu.vector_store %arg8[%c0_82, %c0_83], %314 {strides = array<i32>} : memref<2x32xf32, #tpu.memory_space<vmem>>, vector<2x32xf32>,
    %c0_84 = arith.constant 0 : index
    %c0_85 = arith.constant 0 : index
    %321 = vector.load %arg9[%c0_84, %c0_85] : memref<2x32xf32, #tpu.memory_space<vmem>>, vector<2x32xf32>
    tpu.vector_store %arg9[%c0_84, %c0_85], %312 {strides = array<i32>} : memref<2x32xf32, #tpu.memory_space<vmem>>, vector<2x32xf32>,
    %c0_i32_86 = arith.constant 0 : i32
    %322 = arith.cmpi eq, %arg0, %c0_i32_86 : i32
    %323 = arith.extui %322 : i1 to i32
    %c0_i32_87 = arith.constant 0 : i32
    %324 = arith.cmpi ne, %323, %c0_i32_87 : i32
    scf.if %324 {
      %c0_88 = arith.constant 0 : index
      %c0_89 = arith.constant 0 : index
      %325 = vector.load %arg6[%c0_88, %c0_89] : memref<2x32xf32, #tpu.memory_space<vmem>>, vector<2x32xf32>
      tpu.vector_store %arg6[%c0_88, %c0_89], %314 {strides = array<i32>} : memref<2x32xf32, #tpu.memory_space<vmem>>, vector<2x32xf32>,
      %c0_90 = arith.constant 0 : index
      %c0_91 = arith.constant 0 : index
      %326 = vector.load %arg7[%c0_90, %c0_91] : memref<2x32xf32, #tpu.memory_space<vmem>>, vector<2x32xf32>
      tpu.vector_store %arg7[%c0_90, %c0_91], %312 {strides = array<i32>} : memref<2x32xf32, #tpu.memory_space<vmem>>, vector<2x32xf32>,
    } else {
    }
    return
  }
  func.func @transform_0(%arg0: i32) -> (i32, i32, i32) {
    %c0_i32 = arith.constant 0 : i32
    %c0_i32_0 = arith.constant 0 : i32
    %c0_i32_1 = arith.constant 0 : i32
    return %arg0, %c0_i32, %c0_i32_0 : i32, i32, i32
  }
  func.func @transform_1(%arg0: i32) -> (i32, i32) {
    %c0_i32 = arith.constant 0 : i32
    %c0_i32_0 = arith.constant 0 : i32
    %c0_i32_1 = arith.constant 0 : i32
    return %c0_i32, %c0_i32_0 : i32, i32
  }
  func.func @transform_2(%arg0: i32) -> (i32, i32) {
    %c0_i32 = arith.constant 0 : i32
    %c0_i32_0 = arith.constant 0 : i32
    %c0_i32_1 = arith.constant 0 : i32
    return %c0_i32, %c0_i32_0 : i32, i32
  }
  func.func @transform_3(%arg0: i32) -> (i32, i32) {
    %c0_i32 = arith.constant 0 : i32
    %c0_i32_0 = arith.constant 0 : i32
    %c0_i32_1 = arith.constant 0 : i32
    return %c0_i32, %c0_i32_0 : i32, i32
  }
  func.func @transform_4(%arg0: i32) -> (i32, i32, i32) {
    %c0_i32 = arith.constant 0 : i32
    %c0_i32_0 = arith.constant 0 : i32
    %c0_i32_1 = arith.constant 0 : i32
    return %arg0, %c0_i32, %c0_i32_0 : i32, i32, i32
  }
  func.func @transform_5(%arg0: i32) -> (i32, i32) {
    %c0_i32 = arith.constant 0 : i32
    %c0_i32_0 = arith.constant 0 : i32
    %c0_i32_1 = arith.constant 0 : i32
    return %c0_i32, %c0_i32_0 : i32, i32
  }
  func.func @transform_6(%arg0: i32) -> (i32, i32) {
    %c0_i32 = arith.constant 0 : i32
    %c0_i32_0 = arith.constant 0 : i32
    %c0_i32_1 = arith.constant 0 : i32
    return %c0_i32, %c0_i32_0 : i32, i32
  }
}

</mosaic_0001>

<bundles_post_ra>
// kernel: tpu_custom_call.1
= control target key start
LH: loop header
LB: loop body
LE: loop exit
PB: predicated region body
PF: predicated region fallthrough
CT: control target
= control target key end

     0   :  { %12 = vsyncpa [#allocation5], 0  ;;  %s1382_s0 = inlined_call_operand.hbm [shape: bf16[8,2,16], index: 0, kind: input, shape index: {}]   ;;  %s1383_s1 = inlined_call_operand.hbm [shape: bf16[16,128], index: 1, kind: input, shape index: {}]   ;;  %s1384_s2 = inlined_call_operand.hbm [shape: bf16[32,128], index: 2, kind: input, shape index: {}]   ;;  %s1385_s3 = inlined_call_operand.vmem [shape: f32[1,128], index: 3, kind: input, shape index: {}]   ;;  %s1386_s4 = inlined_call_operand.hbm [shape: bf16[8,2,32], index: 4, kind: output, shape index: {0}]   ;;  %s1387_s5 = inlined_call_operand.hbm [shape: f32[2,32], index: 5, kind: output, shape index: {1}]   ;;  %s1388_s6 = inlined_call_operand.hbm [shape: f32[2,32], index: 6, kind: output, shape index: {2}]  }
   0x1   :  { %13 = vsyncpa [#allocation8], 0 }
   0x2   :  { %14 = vsyncpa [#allocation6], 0  ;;  %s33_s23 = sshll.u32 %s1383_s1, 4  ;;  %s34_s23 = int_to_ptr.hbm [resolvable:$true] %s33_s23 }
   0x3   :  { %15 = vsyncpa [#allocation12], 0  ;;  %s1150_s24 = smov [#allocation7]   ;;  %s20_s28 = sshll.u32 %s1382_s0, 4  ;;  %s21_s28 = int_to_ptr.hbm [resolvable:$true] %s20_s28 }
   0x4   :  { %s35_s25 = sshll.u32 %s1150_s24, 4  ;;  %s1151_s29 = smov 64   ;;  %s36_s25 = int_to_ptr.vmem [resolvable:$true] %s35_s25 }
   0x5   :  { %s1152_s30 = smov 4   ;;  %s1153_s7 = smov [#allocation4]  }
   0x6   :  { %41 = dma.hbm_to_vmem [thread:$0]  %s34_s23, 128, %s36_s25, [#allocation8], %s1151_s29, %s1151_s29, %s1152_s30  }
   0x7   :  { %s22_s8 = sshll.u32 %s1153_s7, 4  ;;  %s1154_s9 = smov 16   ;;  %s23_s8 = int_to_ptr.vmem [resolvable:$true] %s22_s8 }
   0x8   :  { %s1155_s1 = smov 1   ;;  %s46_s12 = sshll.u32 %s1384_s2, 4  ;;  %s47_s12 = int_to_ptr.hbm [resolvable:$true] %s46_s12 }
   0x9   :  { %28 = dma.hbm_to_vmem [thread:$0]  %s21_s28, 128, %s23_s8, [#allocation5], %s1154_s9, %s1154_s9, %s1155_s1  }
   0xa   :  { %s1156_s0 = smov [#allocation9]  }
   0xb   :  { %s48_s13 = sshll.u32 %s1156_s0, 4  ;;  %s49_s13 = int_to_ptr.vmem [resolvable:$true] %s48_s13 }
   0xc   :  { %54 = dma.hbm_to_vmem [thread:$0]  %s47_s12, 256, %s49_s13, [#allocation8], %s1151_s29, %s1151_s29, %s1152_s30  }
   0xd   :  { %1142 = dma.done.wait [#allocation5], 128  }
   0xe   :  { %1143 = vsyncadd [#allocation5], 4294967168 }
   0xf   :  { %1144 = dma.done.wait [#allocation8], 384  }
  0x10   :  { %1145 = vsyncadd [#allocation8], 4294966912  ;;  %vm74_vm0 = vcmask 254976   ;;  %v1157_v0 = vmov 0.0   ;;  %v1216_v1 = vld [vmem:[#allocation9 + $0x8] sm:$0xff]  ;;  %v1218_v2 = vld [vmem:[#allocation7] sm:$0xff] }
  0x11   :  { %75 = vst.msk [vmem:[#allocation2] sm:$0x3] %vm74_vm0, %v1157_v0  ;;  %110 = vmatpush.bf16.msra.mxu0 %v1216_v1  ;;  %134 = vmatpush.bf16.msra.mxu1 %v1218_v2  ;;  %v86_v3 = vld [vmem:[#allocation4] sm:$0x1]  ;;  %vm123_vm1 = vcmask 130048   ;;  %v1222_v4 = vld [vmem:[#allocation9] sm:$0xff] }
  0x12   :  { %76 = vst.msk [vmem:[#allocation3] sm:$0x3] %vm74_vm0, %v1157_v0  ;;  %230 = vmatpush.bf16.msra.mxu3 %v1218_v2  ;;  %213 = vmatpush.bf16.msra.mxu2 %v1216_v1  ;;  %vm100_vm2 = vcmask 261120   ;;  %v1243_v8 = vld [vmem:[%s1385_s3] ss:$0 sm:$0xff]  ;;  %s1158_s15 = smov 32  }
  0x13   :  { %v199_v36 = vld [vmem:[#allocation4 + $0x1] sm:$0x1]  ;;  %s1159_s3 = smov 96   ;;  %s1160_s16 = smov [#allocation11]  }
  0x14   :  { %894 = vmatmul.msk.bf16.vlgmr.msra.gmra.mxu1 %vm123_vm1, %v86_v3  ;;  %s848_s17 = sshll.u32 %s1160_s16, 4  ;;  %s850_s20 = sshll.u32 %s1387_s5, 4  ;;  %s849_s17 = int_to_ptr.vmem [resolvable:$true] %s848_s17  ;;  %s851_s20 = int_to_ptr.hbm [resolvable:$true] %s850_s20 }
  0x15   :  { %301 = vmatpush.bf16.msrb.mxu1 %v1216_v1  ;;  %111 = vmatpush.bf16.msra.mxu0 %v1222_v4  ;;  %s1161_s21 = smov [#allocation13]   ;;  %s861_s25 = sshll.u32 %s1388_s6, 4  ;;  %s862_s25 = int_to_ptr.hbm [resolvable:$true] %s861_s25 }
  0x16   :  { %318 = vmatpush.bf16.msrb.mxu3 %v1218_v2  ;;  %214 = vmatpush.bf16.msra.mxu2 %v1222_v4  ;;  %s859_s22 = sshll.u32 %s1161_s21, 4  ;;  %s1162_s5 = smov [#allocation10]   ;;  %s860_s22 = int_to_ptr.vmem [resolvable:$true] %s859_s22 }
  0x17   :  { %897 = vmatmul.msk.bf16.vlgmr.msra.gmra.mxu3 %vm123_vm1, %v199_v36  ;;  %s834_s26 = sshll.u32 %s1162_s5, 4  ;;  %s835_s26 = int_to_ptr.vmem [resolvable:$true] %s834_s26 }
  0x18   :  { %v84_v5 = vld [vmem:[#allocation2] sm:$0x3] }
  0x19   :  { %v87_v6 = vpack.c.bf16 %v84_v5, %v84_v5  ;;  %389 = vmatpush.bf16.msrb.mxu0 %v1216_v1  ;;  %302 = vmatpush.bf16.msrb.mxu1 %v1222_v4  ;;  %v85_v15 = vld [vmem:[#allocation3] sm:$0x3] }
  0x1a   :  { %406 = vmatpush.bf16.msrb.mxu2 %v1218_v2  ;;  %494 = vmatpush.bf16.msra.mxu3 %v1218_v2 }
  0x1b   :  { %889 = vmatmul.msk.bf16.vlgmr.msra.gmra.mxu0 %vm100_vm2, %v87_v6 }
  0x1d   :  { %477 = vmatpush.bf16.msra.mxu1 %v1216_v1  ;;  %390 = vmatpush.bf16.msrb.mxu0 %v1222_v4 }
  0x21   :  { %565 = vmatpush.bf16.msra.mxu0 %v1216_v1  ;;  %478 = vmatpush.bf16.msra.mxu1 %v1222_v4 }
  0x25   :  { %566 = vmatpush.bf16.msra.mxu0 %v1222_v4 }
  0x91   :  { %v136_v7 = vpop.f32.mrf.mxu1 }
  0x98   :  { %v113_v9 = vpop.f32.mrf.mxu0 }
  0x99   :  { %v137_v10 = vadd.f32 %v136_v7, %v113_v9  ;;  %v138_v12 = vpop.f32.mrf.mxu1  ;;  %v287_v9 = vld [vmem:[#allocation4 + $0x2] sm:$0x1] }
  0x9a   :  { %v232_v43 = vpop.f32.mrf.mxu3  ;;  %900 = vmatmul.msk.bf16.vlgmr.msrb.gmra.mxu3 %vm123_vm1, %v287_v9 }
  0x9b   :  { %v143_v11 = vadd.f32 %v1243_v8, %v137_v10  ;;  %670 = vmatpush.bf16.msrb.mxu3 %v1218_v2 }
  0x9d   :  { %934 = vtanh.f32 %v143_v11  ;;  %v895_v16 = vmul.f32 -1.442695, %v143_v11 }
  0x9f   :  { %936 = vpow2.f32 %v895_v16 }
  0xa0   :  { %v115_v13 = vpop.f32.mrf.mxu0 }
  0xa2   :  { %v234_v44 = vpop.f32.mrf.mxu3 }
  0xa3   :  { %v935_v14 = vpop.eup %934 }
  0xa4   :  { %170 = vrot.lane.b32.xlu0 %v935_v14, %s1151_s29 }
  0xa5   :  { %v937_v17 = vpop.eup %936 }
  0xa6   :  { %v147_v18 = vadd.f32 1.0, %v937_v17 }
  0xa8   :  { %938 = vrcp.f32 %v147_v18  ;;  %v159_v24 = vand.u32 2147483648, %v147_v18  ;;  %vm153_vm4 = vweird.f32 %v147_v18  ;;  %v157_v25 = vand.u32 2147483647, %v147_v18 }
  0xaa   :  { %v160_v27 = vor.u32 1.1754944e-38, %v159_v24  ;;  %vm158_vm6 = vcmp.eq.f32.partialorder %v157_v25, 8.507059e+37 }
  0xac   :  { %165 = vrot.lane.b32.xlu0 %v85_v15, %s1158_s15 }
  0xae   :  { %v939_v19 = vpop.eup %938 }
  0xaf   :  { %v149_v20 = vmul.f32 %v939_v19, %v147_v18  ;;  %vm154_vm3 = vweird.f32 %v939_v19 }
  0xb0   :  { %vm155_vm5 = vmor %vm153_vm4, %vm154_vm3 }
  0xb1   :  { %v150_v21 = vsub.f32 1.0, %v149_v20 }
  0xb3   :  { %v151_v22 = vmul.f32 %v939_v19, %v150_v21 }
  0xb5   :  { %v152_v23 = vadd.f32 %v939_v19, %v151_v22 }
  0xb7   :  { %v156_v26 = vsel %vm155_vm5, %v939_v19, %v152_v23 }
  0xb8   :  { %v161_v29 = vsel %vm158_vm6, %v160_v27, %v156_v26 }
 0x116   :  { %v171_v28 = vpop.permute.xlu0 %170 }
 0x117   :  { %v173_v30 = vmul.f32 %v171_v28, %v161_v29 }
 0x119   :  { %175 = vrot.lane.b32.xlu1 %v173_v30, %s1158_s15 }
 0x11d   :  { %v320_v16 = vpop.f32.mrf.mxu3 }
 0x11e   :  { %v166_v31 = vpop.permute.xlu0 %165 }
 0x11f   :  { %v168_v32 = vmul.f32 %v166_v31, %v161_v29 }
 0x125   :  { %v322_v17 = vpop.f32.mrf.mxu3 }
 0x18b   :  { %v176_v33 = vpop.permute.xlu1 %175 }
 0x18c   :  { %v178_v34 = vadd.f32 %v176_v33, %v168_v32 }
 0x18e   :  { %940 = vtanh.f32 %v178_v34 }
 0x194   :  { %v941_v35 = vpop.eup %940 }
 0x195   :  { %181 = vrot.lane.b32.xlu1 %v941_v35, %s1151_s29 }
 0x207   :  { %v182_v37 = vpop.permute.xlu1 %181 }
 0x208   :  { %v184_v38 = vmul.f32 %v182_v37, %v161_v29 }
 0x20a   :  { %v1252_v39 = vpack.c.bf16 %v184_v38, %v184_v38 }
 0x20c   :  { %v200_v40 = vunpack.c.l.b16 %v1252_v39 }
 0x20e   :  { %v201_v41 = vpack.c.b16 %v200_v40, %v200_v40 }
 0x210   :  { %202 = vrot.lane.b32.xlu2 %v201_v41, %s1158_s15 }
 0x26a   :  { %v203_v42 = vpop.permute.xlu2 %202 }
 0x26b   :  { %896 = vmatmul.msk.bf16.vlgmr.msra.gmra.mxu2 %vm100_vm2, %v203_v42 }
 0x26c   :  { %582 = vmatpush.bf16.msra.mxu2 %v1218_v2 }
 0x2ee   :  { %v216_v45 = vpop.f32.mrf.mxu2 }
 0x2ef   :  { %v233_v46 = vadd.f32 %v232_v43, %v216_v45  ;;  %v375_v43 = vld [vmem:[#allocation4 + $0x3] sm:$0x1] }
 0x2f0   :  { %903 = vmatmul.msk.bf16.vlgmr.msrb.gmra.mxu2 %vm123_vm1, %v375_v43 }
 0x2f1   :  { %v236_v47 = vadd.f32 %v1243_v8, %v233_v46  ;;  %758 = vmatpush.bf16.msrb.mxu2 %v1218_v2 }
 0x2f3   :  { %942 = vtanh.f32 %v236_v47  ;;  %v898_v50 = vmul.f32 -1.442695, %v236_v47 }
 0x2f5   :  { %944 = vpow2.f32 %v898_v50 }
 0x2f6   :  { %v218_v48 = vpop.f32.mrf.mxu2 }
 0x2f9   :  { %v943_v49 = vpop.eup %942 }
 0x2fa   :  { %259 = vrot.lane.b32.xlu2 %v943_v49, %s1151_s29 }
 0x2fb   :  { %v945_v51 = vpop.eup %944 }
 0x2fc   :  { %v240_v52 = vadd.f32 1.0, %v945_v51 }
 0x2fe   :  { %946 = vrcp.f32 %v240_v52  ;;  %v252_v58 = vand.u32 2147483648, %v240_v52  ;;  %vm246_vm8 = vweird.f32 %v240_v52  ;;  %v250_v59 = vand.u32 2147483647, %v240_v52 }
 0x300   :  { %v253_v61 = vor.u32 1.1754944e-38, %v252_v58  ;;  %vm251_vm10 = vcmp.eq.f32.partialorder %v250_v59, 8.507059e+37 }
 0x304   :  { %v947_v53 = vpop.eup %946 }
 0x305   :  { %v242_v54 = vmul.f32 %v947_v53, %v240_v52  ;;  %vm247_vm7 = vweird.f32 %v947_v53 }
 0x306   :  { %vm248_vm9 = vmor %vm246_vm8, %vm247_vm7 }
 0x307   :  { %v243_v55 = vsub.f32 1.0, %v242_v54 }
 0x309   :  { %v244_v56 = vmul.f32 %v947_v53, %v243_v55 }
 0x30b   :  { %v245_v57 = vadd.f32 %v947_v53, %v244_v56 }
 0x30d   :  { %v249_v60 = vsel %vm248_vm9, %v947_v53, %v245_v57 }
 0x30e   :  { %v254_v63 = vsel %vm251_vm10, %v253_v61, %v249_v60 }
 0x30f   :  { %v257_v3 = vmul.f32 %v254_v63, %v178_v34 }
 0x354   :  { %v260_v62 = vpop.permute.xlu2 %259 }
 0x355   :  { %v262_v0 = vmul.f32 %v260_v62, %v254_v63 }
 0x357   :  { %264 = vrot.lane.b32.xlu0 %v262_v0, %s1158_s15 }
 0x373   :  { %v408_v49 = vpop.f32.mrf.mxu2 }
 0x37b   :  { %v410_v50 = vpop.f32.mrf.mxu2 }
 0x3c9   :  { %v265_v5 = vpop.permute.xlu0 %264 }
 0x3ca   :  { %v267_v6 = vadd.f32 %v265_v5, %v257_v3 }
 0x3cc   :  { %948 = vtanh.f32 %v267_v6 }
 0x3d2   :  { %v949_v7 = vpop.eup %948 }
 0x3d3   :  { %270 = vrot.lane.b32.xlu1 %v949_v7, %s1151_s29 }
 0x445   :  { %v271_v10 = vpop.permute.xlu1 %270 }
 0x446   :  { %v273_v11 = vmul.f32 %v271_v10, %v254_v63 }
 0x448   :  { %v1264_v12 = vpack.c.bf16 %v273_v11, %v273_v11 }
 0x44a   :  { %v288_v13 = vunpack.c.l.b16 %v1264_v12 }
 0x44c   :  { %v289_v14 = vpack.c.b16 %v288_v13, %v288_v13 }
 0x44e   :  { %290 = vrot.lane.b32.xlu2 %v289_v14, %s1158_s15  ;;  %v463_v14 = vld [vmem:[#allocation4 + $0x4] sm:$0x1] }
 0x44f   :  { %906 = vmatmul.msk.bf16.vlgmr.msra.gmra.mxu3 %vm123_vm1, %v463_v14 }
 0x4a8   :  { %v291_v15 = vpop.permute.xlu2 %290 }
 0x4a9   :  { %899 = vmatmul.msk.bf16.vlgmr.msrb.gmra.mxu1 %vm100_vm2, %v291_v15 }
 0x4aa   :  { %653 = vmatpush.bf16.msrb.mxu1 %v1216_v1 }
 0x4ae   :  { %654 = vmatpush.bf16.msrb.mxu1 %v1222_v4 }
 0x526   :  { %v304_v18 = vpop.f32.mrf.mxu1 }
 0x527   :  { %v321_v19 = vadd.f32 %v320_v16, %v304_v18 }
 0x529   :  { %v324_v20 = vadd.f32 %v1243_v8, %v321_v19 }
 0x52b   :  { %950 = vtanh.f32 %v324_v20  ;;  %v901_v23 = vmul.f32 -1.442695, %v324_v20  ;;  %v496_v20 = vpop.f32.mrf.mxu3 }
 0x52d   :  { %952 = vpow2.f32 %v901_v23 }
 0x52e   :  { %v306_v21 = vpop.f32.mrf.mxu1 }
 0x531   :  { %v951_v22 = vpop.eup %950 }
 0x532   :  { %347 = vrot.lane.b32.xlu0 %v951_v22, %s1151_s29 }
 0x533   :  { %v953_v24 = vpop.eup %952  ;;  %v498_v21 = vpop.f32.mrf.mxu3 }
 0x534   :  { %v328_v25 = vadd.f32 1.0, %v953_v24  ;;  %v639_v21 = vld [vmem:[#allocation4 + $0x6] sm:$0x1] }
 0x535   :  { %912 = vmatmul.msk.bf16.vlgmr.msrb.gmra.mxu3 %vm123_vm1, %v639_v21 }
 0x536   :  { %954 = vrcp.f32 %v328_v25  ;;  %v340_v31 = vand.u32 2147483648, %v328_v25  ;;  %vm334_vm12 = vweird.f32 %v328_v25  ;;  %v338_v32 = vand.u32 2147483647, %v328_v25 }
 0x538   :  { %v341_v34 = vor.u32 1.1754944e-38, %v340_v31  ;;  %vm339_vm14 = vcmp.eq.f32.partialorder %v338_v32, 8.507059e+37 }
 0x53c   :  { %v955_v26 = vpop.eup %954 }
 0x53d   :  { %v330_v27 = vmul.f32 %v955_v26, %v328_v25  ;;  %vm335_vm11 = vweird.f32 %v955_v26 }
 0x53e   :  { %vm336_vm13 = vmor %vm334_vm12, %vm335_vm11 }
 0x53f   :  { %v331_v28 = vsub.f32 1.0, %v330_v27 }
 0x541   :  { %v332_v29 = vmul.f32 %v955_v26, %v331_v28 }
 0x543   :  { %v333_v30 = vadd.f32 %v955_v26, %v332_v29 }
 0x545   :  { %v337_v33 = vsel %vm336_vm13, %v955_v26, %v333_v30 }
 0x546   :  { %v342_v36 = vsel %vm339_vm14, %v341_v34, %v337_v33 }
 0x547   :  { %v345_v38 = vmul.f32 %v342_v36, %v267_v6 }
 0x5a4   :  { %v348_v35 = vpop.permute.xlu0 %347 }
 0x5a5   :  { %v350_v37 = vmul.f32 %v348_v35, %v342_v36 }
 0x5a7   :  { %352 = vrot.lane.b32.xlu1 %v350_v37, %s1158_s15 }
 0x619   :  { %v353_v40 = vpop.permute.xlu1 %352 }
 0x61a   :  { %v355_v41 = vadd.f32 %v353_v40, %v345_v38 }
 0x61c   :  { %956 = vtanh.f32 %v355_v41 }
 0x622   :  { %v957_v42 = vpop.eup %956 }
 0x623   :  { %358 = vrot.lane.b32.xlu2 %v957_v42, %s1151_s29 }
 0x67d   :  { %v359_v44 = vpop.permute.xlu2 %358 }
 0x67e   :  { %v361_v45 = vmul.f32 %v359_v44, %v342_v36 }
 0x680   :  { %v1277_v46 = vpack.c.bf16 %v361_v45, %v361_v45 }
 0x682   :  { %v376_v47 = vunpack.c.l.b16 %v1277_v46 }
 0x684   :  { %v377_v48 = vpack.c.b16 %v376_v47, %v376_v47 }
 0x686   :  { %378 = vrot.lane.b32.xlu0 %v377_v48, %s1158_s15 }
 0x6f8   :  { %v379_v51 = vpop.permute.xlu0 %378 }
 0x6f9   :  { %902 = vmatmul.msk.bf16.vlgmr.msrb.gmra.mxu0 %vm100_vm2, %v379_v51 }
 0x6fa   :  { %741 = vmatpush.bf16.msrb.mxu0 %v1216_v1 }
 0x6fe   :  { %742 = vmatpush.bf16.msrb.mxu0 %v1222_v4 }
 0x776   :  { %v392_v52 = vpop.f32.mrf.mxu0 }
 0x777   :  { %v409_v2 = vadd.f32 %v408_v49, %v392_v52  ;;  %v551_v49 = vld [vmem:[#allocation4 + $0x5] sm:$0x1] }
 0x778   :  { %909 = vmatmul.msk.bf16.vlgmr.msra.gmra.mxu2 %vm123_vm1, %v551_v49 }
 0x779   :  { %v412_v53 = vadd.f32 %v1243_v8, %v409_v2 }
 0x77b   :  { %958 = vtanh.f32 %v412_v53  ;;  %v904_v56 = vmul.f32 -1.442695, %v412_v53 }
 0x77d   :  { %960 = vpow2.f32 %v904_v56 }
 0x77e   :  { %v394_v54 = vpop.f32.mrf.mxu0 }
 0x781   :  { %v959_v55 = vpop.eup %958 }
 0x782   :  { %435 = vrot.lane.b32.xlu1 %v959_v55, %s1151_s29 }
 0x783   :  { %v961_v57 = vpop.eup %960 }
 0x784   :  { %v416_v58 = vadd.f32 1.0, %v961_v57 }
 0x786   :  { %962 = vrcp.f32 %v416_v58  ;;  %v428_v4 = vand.u32 2147483648, %v416_v58  ;;  %vm422_vm3 = vweird.f32 %v416_v58  ;;  %v426_v63 = vand.u32 2147483647, %v416_v58 }
 0x788   :  { %v429_v3 = vor.u32 1.1754944e-38, %v428_v4  ;;  %vm427_vm5 = vcmp.eq.f32.partialorder %v426_v63, 8.507059e+37 }
 0x78c   :  { %v963_v59 = vpop.eup %962 }
 0x78d   :  { %v418_v60 = vmul.f32 %v963_v59, %v416_v58  ;;  %vm423_vm15 = vweird.f32 %v963_v59 }
 0x78e   :  { %vm424_vm4 = vmor %vm422_vm3, %vm423_vm15 }
 0x78f   :  { %v419_v61 = vsub.f32 1.0, %v418_v60 }
 0x791   :  { %v420_v1 = vmul.f32 %v963_v59, %v419_v61 }
 0x793   :  { %v421_v62 = vadd.f32 %v963_v59, %v420_v1 }
 0x795   :  { %v425_v0 = vsel %vm424_vm4, %v963_v59, %v421_v62 }
 0x796   :  { %v430_v6 = vsel %vm427_vm5, %v429_v3, %v425_v0 }
 0x797   :  { %v433_v9 = vmul.f32 %v430_v6, %v355_v41 }
 0x7f4   :  { %v436_v5 = vpop.permute.xlu1 %435 }
 0x7f5   :  { %v438_v7 = vmul.f32 %v436_v5, %v430_v6 }
 0x7f7   :  { %440 = vrot.lane.b32.xlu2 %v438_v7, %s1158_s15 }
 0x7fb   :  { %v584_v55 = vpop.f32.mrf.mxu2 }
 0x803   :  { %v586_v56 = vpop.f32.mrf.mxu2 }
 0x804   :  { %v727_v56 = vld [vmem:[#allocation4 + $0x7] sm:$0x1] }
 0x805   :  { %915 = vmatmul.msk.bf16.vlgmr.msrb.gmra.mxu2 %vm123_vm1, %v727_v56  ;;  %vm188_vm1 = vcmask 1040384  }
 0x851   :  { %v441_v10 = vpop.permute.xlu2 %440 }
 0x852   :  { %v443_v11 = vadd.f32 %v441_v10, %v433_v9 }
 0x854   :  { %964 = vtanh.f32 %v443_v11 }
 0x85a   :  { %v965_v13 = vpop.eup %964 }
 0x85b   :  { %446 = vrot.lane.b32.xlu0 %v965_v13, %s1151_s29 }
 0x8cd   :  { %v447_v15 = vpop.permute.xlu0 %446 }
 0x8ce   :  { %v449_v16 = vmul.f32 %v447_v15, %v430_v6 }
 0x8d0   :  { %v1289_v17 = vpack.c.bf16 %v449_v16, %v449_v16 }
 0x8d2   :  { %v464_v18 = vunpack.c.l.b16 %v1289_v17 }
 0x8d4   :  { %v465_v19 = vpack.c.b16 %v464_v18, %v464_v18 }
 0x8d6   :  { %466 = vrot.lane.b32.xlu1 %v465_v19, %s1158_s15 }
 0x948   :  { %v467_v22 = vpop.permute.xlu1 %466 }
 0x949   :  { %905 = vmatmul.msk.bf16.vlgmr.msra.gmra.mxu1 %vm100_vm2, %v467_v22 }
 0x9c6   :  { %v480_v23 = vpop.f32.mrf.mxu1 }
 0x9c7   :  { %v497_v24 = vadd.f32 %v496_v20, %v480_v23 }
 0x9c9   :  { %v500_v25 = vadd.f32 %v1243_v8, %v497_v24 }
 0x9cb   :  { %966 = vtanh.f32 %v500_v25  ;;  %v907_v28 = vmul.f32 -1.442695, %v500_v25 }
 0x9cd   :  { %968 = vpow2.f32 %v907_v28 }
 0x9ce   :  { %v482_v26 = vpop.f32.mrf.mxu1 }
 0x9d1   :  { %v967_v27 = vpop.eup %966 }
 0x9d2   :  { %523 = vrot.lane.b32.xlu2 %v967_v27, %s1151_s29  ;;  %v672_v27 = vpop.f32.mrf.mxu3 }
 0x9d3   :  { %v969_v29 = vpop.eup %968 }
 0x9d4   :  { %v504_v30 = vadd.f32 1.0, %v969_v29 }
 0x9d6   :  { %970 = vrcp.f32 %v504_v30  ;;  %v516_v36 = vand.u32 2147483648, %v504_v30  ;;  %vm510_vm7 = vweird.f32 %v504_v30  ;;  %v514_v37 = vand.u32 2147483647, %v504_v30 }
 0x9d8   :  { %v517_v40 = vor.u32 1.1754944e-38, %v516_v36  ;;  %vm515_vm9 = vcmp.eq.f32.partialorder %v514_v37, 8.507059e+37 }
 0x9da   :  { %v674_v28 = vpop.f32.mrf.mxu3 }
 0x9dc   :  { %v971_v31 = vpop.eup %970 }
 0x9dd   :  { %v506_v32 = vmul.f32 %v971_v31, %v504_v30  ;;  %vm511_vm6 = vweird.f32 %v971_v31 }
 0x9de   :  { %vm512_vm8 = vmor %vm510_vm7, %vm511_vm6 }
 0x9df   :  { %v507_v33 = vsub.f32 1.0, %v506_v32 }
 0x9e1   :  { %v508_v34 = vmul.f32 %v971_v31, %v507_v33 }
 0x9e3   :  { %v509_v35 = vadd.f32 %v971_v31, %v508_v34 }
 0x9e5   :  { %v513_v38 = vsel %vm512_vm8, %v971_v31, %v509_v35  ;;  %vm196_vm8 = vcmask 253952  }
 0x9e6   :  { %v518_v42 = vsel %vm515_vm9, %v517_v40, %v513_v38 }
 0x9e7   :  { %v521_v44 = vmul.f32 %v518_v42, %v443_v11 }
 0xa2c   :  { %v524_v41 = vpop.permute.xlu2 %523 }
 0xa2d   :  { %v526_v43 = vmul.f32 %v524_v41, %v518_v42 }
 0xa2f   :  { %528 = vrot.lane.b32.xlu0 %v526_v43, %s1158_s15 }
 0xaa1   :  { %v529_v45 = vpop.permute.xlu0 %528 }
 0xaa2   :  { %v531_v47 = vadd.f32 %v529_v45, %v521_v44 }
 0xaa4   :  { %972 = vtanh.f32 %v531_v47 }
 0xaaa   :  { %v973_v48 = vpop.eup %972 }
 0xaab   :  { %534 = vrot.lane.b32.xlu1 %v973_v48, %s1151_s29 }
 0xb1d   :  { %v535_v50 = vpop.permute.xlu1 %534 }
 0xb1e   :  { %v537_v51 = vmul.f32 %v535_v50, %v518_v42 }
 0xb20   :  { %v1299_v52 = vpack.c.bf16 %v537_v51, %v537_v51 }
 0xb22   :  { %v552_v2 = vunpack.c.l.b16 %v1299_v52 }
 0xb24   :  { %v553_v53 = vpack.c.b16 %v552_v2, %v552_v2 }
 0xb26   :  { %554 = vrot.lane.b32.xlu2 %v553_v53, %s1158_s15 }
 0xb80   :  { %v555_v54 = vpop.permute.xlu2 %554 }
 0xb81   :  { %908 = vmatmul.msk.bf16.vlgmr.msra.gmra.mxu0 %vm100_vm2, %v555_v54 }
 0xbfe   :  { %v568_v57 = vpop.f32.mrf.mxu0 }
 0xbff   :  { %v585_v58 = vadd.f32 %v584_v55, %v568_v57 }
 0xc01   :  { %v588_v59 = vadd.f32 %v1243_v8, %v585_v58 }
 0xc03   :  { %974 = vtanh.f32 %v588_v59  ;;  %v910_v1 = vmul.f32 -1.442695, %v588_v59 }
 0xc05   :  { %976 = vpow2.f32 %v910_v1  ;;  %v760_v1 = vpop.f32.mrf.mxu2 }
 0xc06   :  { %v570_v60 = vpop.f32.mrf.mxu0 }
 0xc09   :  { %v975_v61 = vpop.eup %974 }
 0xc0a   :  { %611 = vrot.lane.b32.xlu0 %v975_v61, %s1151_s29 }
 0xc0b   :  { %v977_v62 = vpop.eup %976 }
 0xc0c   :  { %v592_v4 = vadd.f32 1.0, %v977_v62 }
 0xc0d   :  { %v762_v62 = vpop.f32.mrf.mxu2 }
 0xc0e   :  { %978 = vrcp.f32 %v592_v4  ;;  %v604_v7 = vand.u32 2147483648, %v592_v4  ;;  %vm598_vm11 = vweird.f32 %v592_v4  ;;  %v602_v9 = vand.u32 2147483647, %v592_v4 }
 0xc10   :  { %v605_v11 = vor.u32 1.1754944e-38, %v604_v7  ;;  %vm603_vm13 = vcmp.eq.f32.partialorder %v602_v9, 8.507059e+37  ;;  %v364_v7 = vrot.slane %v1277_v46, 3 }
 0xc12   :  { %v367_v9 = vsel %vm188_vm1, %v1277_v46, %v364_v7 }
 0xc14   :  { %v979_v63 = vpop.eup %978 }
 0xc15   :  { %v594_v0 = vmul.f32 %v979_v63, %v592_v4  ;;  %vm599_vm10 = vweird.f32 %v979_v63 }
 0xc16   :  { %vm600_vm12 = vmor %vm598_vm11, %vm599_vm10 }
 0xc17   :  { %v595_v3 = vsub.f32 1.0, %v594_v0 }
 0xc19   :  { %v596_v5 = vmul.f32 %v979_v63, %v595_v3 }
 0xc1b   :  { %v597_v6 = vadd.f32 %v979_v63, %v596_v5 }
 0xc1d   :  { %v601_v10 = vsel %vm600_vm12, %v979_v63, %v597_v6 }
 0xc1e   :  { %v606_v14 = vsel %vm603_vm13, %v605_v11, %v601_v10 }
 0xc1f   :  { %v609_v16 = vmul.f32 %v606_v14, %v531_v47 }
 0xc7c   :  { %v612_v13 = vpop.permute.xlu0 %611 }
 0xc7d   :  { %v614_v15 = vmul.f32 %v612_v13, %v606_v14 }
 0xc7f   :  { %616 = vrot.lane.b32.xlu1 %v614_v15, %s1158_s15 }
 0xcf1   :  { %v617_v18 = vpop.permute.xlu1 %616 }
 0xcf2   :  { %v619_v19 = vadd.f32 %v617_v18, %v609_v16 }
 0xcf4   :  { %980 = vtanh.f32 %v619_v19 }
 0xcfa   :  { %v981_v20 = vpop.eup %980 }
 0xcfb   :  { %622 = vrot.lane.b32.xlu2 %v981_v20, %s1151_s29 }
 0xd55   :  { %v623_v22 = vpop.permute.xlu2 %622 }
 0xd56   :  { %v625_v23 = vmul.f32 %v623_v22, %v606_v14 }
 0xd58   :  { %v1309_v24 = vpack.c.bf16 %v625_v23, %v625_v23 }
 0xd5a   :  { %v640_v25 = vunpack.c.l.b16 %v1309_v24  ;;  %v628_v10 = vrot.slane %v1309_v24, 3 }
 0xd5c   :  { %v641_v26 = vpack.c.b16 %v640_v25, %v640_v25  ;;  %v631_v11 = vsel %vm188_vm1, %v1309_v24, %v628_v10 }
 0xd5e   :  { %642 = vrot.lane.b32.xlu0 %v641_v26, %s1158_s15 }
 0xdd0   :  { %v643_v29 = vpop.permute.xlu0 %642 }
 0xdd1   :  { %911 = vmatmul.msk.bf16.vlgmr.msrb.gmra.mxu1 %vm100_vm2, %v643_v29 }
 0xe4e   :  { %v656_v30 = vpop.f32.mrf.mxu1 }
 0xe4f   :  { %v673_v31 = vadd.f32 %v672_v27, %v656_v30  ;;  %v187_v27 = vrot.slane %v1252_v39, 3  ;;  %v452_v30 = vrot.slane %v1289_v17, 3 }
 0xe51   :  { %v676_v32 = vadd.f32 %v1243_v8, %v673_v31  ;;  %v191_v29 = vsel %vm188_vm1, %v1252_v39, %v187_v27 }
 0xe53   :  { %982 = vtanh.f32 %v676_v32  ;;  %v913_v35 = vmul.f32 -1.442695, %v676_v32  ;;  %v455_v32 = vsel %vm188_vm1, %v1289_v17, %v452_v30  ;;  %v276_v17 = vrot.slane %v1264_v12, 3 }
 0xe55   :  { %984 = vpow2.f32 %v913_v35 }
 0xe56   :  { %v658_v33 = vpop.f32.mrf.mxu1 }
 0xe59   :  { %v983_v34 = vpop.eup %982 }
 0xe5a   :  { %699 = vrot.lane.b32.xlu1 %v983_v34, %s1151_s29 }
 0xe5b   :  { %v985_v36 = vpop.eup %984 }
 0xe5c   :  { %v680_v37 = vadd.f32 1.0, %v985_v36 }
 0xe5e   :  { %986 = vrcp.f32 %v680_v37  ;;  %v692_v44 = vand.u32 2147483648, %v680_v37  ;;  %vm686_vm15 = vweird.f32 %v680_v37  ;;  %v690_v45 = vand.u32 2147483647, %v680_v37 }
 0xe60   :  { %v693_v48 = vor.u32 1.1754944e-38, %v692_v44  ;;  %vm691_vm4 = vcmp.eq.f32.partialorder %v690_v45, 8.507059e+37 }
 0xe64   :  { %v987_v38 = vpop.eup %986 }
 0xe65   :  { %v682_v40 = vmul.f32 %v987_v38, %v680_v37  ;;  %vm687_vm14 = vweird.f32 %v987_v38 }
 0xe66   :  { %vm688_vm3 = vmor %vm686_vm15, %vm687_vm14 }
 0xe67   :  { %v683_v41 = vsub.f32 1.0, %v682_v40 }
 0xe69   :  { %v684_v42 = vmul.f32 %v987_v38, %v683_v41  ;;  %v279_v41 = vsel %vm188_vm1, %v1264_v12, %v276_v17 }
 0xe6b   :  { %v685_v43 = vadd.f32 %v987_v38, %v684_v42  ;;  %v540_v42 = vrot.slane %v1299_v52, 3 }
 0xe6d   :  { %v689_v47 = vsel %vm688_vm3, %v987_v38, %v685_v43  ;;  %v543_v44 = vsel %vm188_vm1, %v1299_v52, %v540_v42 }
 0xe6e   :  { %v694_v50 = vsel %vm691_vm4, %v693_v48, %v689_v47 }
 0xe6f   :  { %v697_v2 = vmul.f32 %v694_v50, %v619_v19 }
 0xecc   :  { %v700_v49 = vpop.permute.xlu1 %699 }
 0xecd   :  { %v702_v51 = vmul.f32 %v700_v49, %v694_v50 }
 0xecf   :  { %704 = vrot.lane.b32.xlu2 %v702_v51, %s1158_s15 }
 0xf29   :  { %v705_v53 = vpop.permute.xlu2 %704 }
 0xf2a   :  { %v1317_v54 = vadd.f32 %v705_v53, %v697_v2 }
 0xf2c   :  { %988 = vtanh.f32 %v1317_v54 }
 0xf32   :  { %v989_v55 = vpop.eup %988 }
 0xf33   :  { %710 = vrot.lane.b32.xlu0 %v989_v55, %s1151_s29 }
 0xfa5   :  { %v711_v57 = vpop.permute.xlu0 %710 }
 0xfa6   :  { %v713_v58 = vmul.f32 %v711_v57, %v694_v50 }
 0xfa8   :  { %v714_v59 = vpack.c.bf16 %v713_v58, %v713_v58 }
 0xfaa   :  { %v728_v60 = vunpack.c.l.b16 %v714_v59  ;;  %v716_v33 = vrot.slane %v714_v59, 3 }
 0xfac   :  { %v729_v61 = vpack.c.b16 %v728_v60, %v728_v60  ;;  %v719_v34 = vsel %vm188_vm1, %v714_v59, %v716_v33 }
 0xfae   :  { %730 = vrot.lane.b32.xlu1 %v729_v61, %s1158_s15 }
0x1020   :  { %v731_v4 = vpop.permute.xlu1 %730 }
0x1021   :  { %914 = vmatmul.msk.bf16.vlgmr.msrb.gmra.mxu0 %vm100_vm2, %v731_v4 }
0x109e   :  { %v744_v63 = vpop.f32.mrf.mxu0 }
0x109f   :  { %v761_v0 = vadd.f32 %v760_v1, %v744_v63 }
0x10a1   :  { %v764_v3 = vadd.f32 %v1243_v8, %v761_v0 }
0x10a3   :  { %990 = vtanh.f32 %v764_v3  ;;  %v916_v8 = vmul.f32 -1.442695, %v764_v3 }
0x10a5   :  { %992 = vpow2.f32 %v916_v8 }
0x10a6   :  { %v746_v5 = vpop.f32.mrf.mxu0 }
0x10a9   :  { %v991_v6 = vpop.eup %990 }
0x10aa   :  { %787 = vrot.lane.b32.xlu2 %v991_v6, %s1151_s29 }
0x10ab   :  { %v993_v13 = vpop.eup %992 }
0x10ac   :  { %v768_v14 = vadd.f32 1.0, %v993_v13 }
0x10ae   :  { %994 = vrcp.f32 %v768_v14  ;;  %v780_v46 = vand.u32 2147483648, %v768_v14  ;;  %vm774_vm5 = vweird.f32 %v768_v14  ;;  %v778_v21 = vand.u32 2147483647, %v768_v14 }
0x10b0   :  { %v781_v23 = vor.u32 1.1754944e-38, %v780_v46  ;;  %vm779_vm7 = vcmp.eq.f32.partialorder %v778_v21, 8.507059e+37 }
0x10b2   :  { %369 = vrot.lane.b32.xlu2 %v367_v9, %s1158_s15 }
0x10b4   :  { %v995_v15 = vpop.eup %994 }
0x10b5   :  { %v770_v16 = vmul.f32 %v995_v15, %v768_v14  ;;  %vm775_vm2 = vweird.f32 %v995_v15 }
0x10b6   :  { %vm776_vm6 = vmor %vm774_vm5, %vm775_vm2 }
0x10b7   :  { %v771_v18 = vsub.f32 1.0, %v770_v16 }
0x10b9   :  { %v772_v19 = vmul.f32 %v995_v15, %v771_v18 }
0x10ba   :  { %633 = vrot.lane.b32.xlu2 %v631_v11, %s1158_s15 }
0x10bb   :  { %v773_v20 = vadd.f32 %v995_v15, %v772_v19 }
0x10bd   :  { %v777_v22 = vsel %vm776_vm6, %v995_v15, %v773_v20 }
0x10be   :  { %v782_v25 = vsel %vm779_vm7, %v781_v23, %v777_v22 }
0x10bf   :  { %v785_v35 = vmul.f32 %v782_v25, %v1317_v54 }
0x1104   :  { %v788_v24 = vpop.permute.xlu2 %787 }
0x1105   :  { %v790_v26 = vmul.f32 %v788_v24, %v782_v25 }
0x1107   :  { %792 = vrot.lane.b32.xlu0 %v790_v26, %s1158_s15 }
0x110c   :  { %v370_v28 = vpop.permute.xlu2 %369 }
0x110d   :  { %373 = vst.msk [vmem:[#allocation10 + $0x2] sm:$0x1] %vm196_vm8, %v370_v28 }
0x110f   :  { %193 = vrot.lane.b32.xlu0 %v191_v29, %s1158_s15 }
0x1114   :  { %v634_v31 = vpop.permute.xlu2 %633 }
0x1115   :  { %637 = vst.msk [vmem:[#allocation10 + $0x5] sm:$0x1] %vm196_vm8, %v634_v31 }
0x1117   :  { %457 = vrot.lane.b32.xlu0 %v455_v32, %s1158_s15 }
0x111f   :  { %721 = vrot.lane.b32.xlu0 %v719_v34, %s1158_s15 }
0x1179   :  { %v793_v39 = vpop.permute.xlu0 %792 }
0x117a   :  { %v795_v36 = vadd.f32 %v793_v39, %v785_v35 }
0x117c   :  { %996 = vtanh.f32 %v795_v36 }
0x1181   :  { %v194_v37 = vpop.permute.xlu0 %193 }
0x1182   :  { %v997_v38 = vpop.eup %996  ;;  %197 = vst.msk [vmem:[#allocation10] sm:$0x1] %vm196_vm8, %v194_v37 }
0x1183   :  { %798 = vrot.lane.b32.xlu1 %v997_v38, %s1151_s29  ;;  %s836_s29 = sshll.u32 %s1386_s4, 4  ;;  %s837_s29 = int_to_ptr.hbm [resolvable:$true] %s836_s29 }
0x1189   :  { %v458_v40 = vpop.permute.xlu0 %457 }
0x118a   :  { %461 = vst.msk [vmem:[#allocation10 + $0x3] sm:$0x1] %vm196_vm8, %v458_v40 }
0x118b   :  { %281 = vrot.lane.b32.xlu1 %v279_v41, %s1158_s15 }
0x1191   :  { %v722_v43 = vpop.permute.xlu0 %721 }
0x1192   :  { %725 = vst.msk [vmem:[#allocation10 + $0x6] sm:$0x1] %vm196_vm8, %v722_v43 }
0x1193   :  { %545 = vrot.lane.b32.xlu1 %v543_v44, %s1158_s15 }
0x11f5   :  { %v799_v45 = vpop.permute.xlu1 %798 }
0x11f6   :  { %v801_v47 = vmul.f32 %v799_v45, %v782_v25 }
0x11f8   :  { %v802_v48 = vpack.c.bf16 %v801_v47, %v801_v47  ;;  %815 = vrot.lane.b32.xlu2 %v801_v47, %s1158_s15 }
0x11fa   :  { %v804_v49 = vrot.slane %v802_v48, 3 }
0x11fc   :  { %v807_v12 = vsel %vm188_vm1, %v802_v48, %v804_v49 }
0x11fd   :  { %809 = vrot.lane.b32.xlu1 %v807_v12, %s1158_s15  ;;  %v282_v50 = vpop.permute.xlu1 %281 }
0x11fe   :  { %285 = vst.msk [vmem:[#allocation10 + $0x1] sm:$0x1] %vm196_vm8, %v282_v50 }
0x1200   :  { %821 = vrot.lane.b32.xlu2 %v795_v36, %s1159_s3 }
0x1205   :  { %v546_v51 = vpop.permute.xlu1 %545 }
0x1206   :  { %549 = vst.msk [vmem:[#allocation10 + $0x4] sm:$0x1] %vm196_vm8, %v546_v51 }
0x1252   :  { %v816_v52 = vpop.permute.xlu2 %815 }
0x1253   :  { %819 = vst.msk [vmem:[#allocation2] sm:$0x3] %vm74_vm0, %v816_v52 }
0x1254   :  { %828 = vst.msk [vmem:[#allocation11] sm:$0x3] %vm74_vm0, %v816_v52 }
0x1255   :  { %853 = dma.vmem_to_hbm [thread:$0]  %s849_s17, 32, %s851_s20, [#allocation12]  }
0x125a   :  { %v822_v2 = vpop.permute.xlu2 %821 }
0x125b   :  { %824 = vst.msk [vmem:[#allocation3] sm:$0x3] %vm74_vm0, %v822_v2 }
0x125c   :  { %829 = vst.msk [vmem:[#allocation13] sm:$0x3] %vm74_vm0, %v822_v2 }
0x125d   :  { %864 = dma.vmem_to_hbm [thread:$0]  %s860_s22, 32, %s862_s25, [#allocation12]  }
0x126f   :  { %v810_v53 = vpop.permute.xlu1 %809 }
0x1270   :  { %813 = vst.msk [vmem:[#allocation10 + $0x7] sm:$0x1] %vm196_vm8, %v810_v53 }
0x1271   :  { %842 = dma.vmem_to_hbm [thread:$0]  %s835_s26, 128, %s837_s29, [#allocation6], %s1154_s9, %s1154_s9, %s1155_s1  }
0x1272   :  { %1146 = dma.done.wait [#allocation6], 128  }
0x1273   :  { %1147 = vsyncadd [#allocation6], 4294967168 }
0x1274   :  { %1148 = dma.done.wait [#allocation12], 64  }
0x1275   :  { %1149 = vsyncadd [#allocation12], 4294967232 }
0x1276   :  { %877 = vsyncpa [#allocation5], 1 }
0x1277   :  { %878 = vsyncpa [#allocation8], 1 }
0x1278   :  { %879 = vsyncpa [#allocation6], 1 }
0x1279   :  { %880 = vsyncpa [#allocation12], 1 }

</bundles_post_ra>
